<compile_context>
chip_gen: v7x
topology: tpu7x:2x2x1
jax: 0.10.0
libtpu: 0.0.40
codegen_flags: <defaults>
</compile_context>

<pallas_src>
import functools

import jax
import jax.numpy as jnp
from jax import lax
from jax.experimental import pallas as pl
from jax.experimental.pallas import tpu as pltpu

# ----------------------------- config -------------------------------------
N_FREQS = 6                       # frequency bands -> encoder.output_dim = 3*2*6 = 36
ENC_DIM = 3 * 2 * N_FREQS         # 36 (>9, so the weight[:, 8] = 1 init is valid)
OUT_DIM = 1
GAMMA = 0.5                       # DReLU gamma

SUB = 8                           # sublane packing of points
MIN_LANES = 128                   # minimum lane width (one vreg row)
CHUNK_LANES = 1024                # lanes per inner fori_loop chunk (8192 points)
MAX_TILE_POINTS = 32768           # points per grid step upper bound (8 x 4096 lanes)


def _round_up(x, m):
    return ((x + m - 1) // m) * m


def _choose_tile(n):
    """Biggest tile up to MAX_TILE_POINTS, but keep >= 2 grid steps (v7x megacore)."""
    min_tile = SUB * MIN_LANES        # 1024 points
    big_tile = SUB * CHUNK_LANES      # 8192 points (chunking granularity)
    half = -(-n // 2)                 # cdiv(n, 2)
    if half <= min_tile:
        return min_tile
    if half <= big_tile:
        return _round_up(half, min_tile)
    return min(MAX_TILE_POINTS, _round_up(half, big_tile))


# ----------------------------- kernel --------------------------------------
def one_layer_mlp_kernel(w_ref, x_ref, o_ref, *, n_freqs, gamma, chunk_lanes):
    # w_ref : (39,) f32 SMEM (scalar-prefetched)
    #         [0:36]  flattened nn.Linear weight; per band k the feature order
    #                 is [sin(2^k x){x,y,z}, cos(2^k x){x,y,z}]; cos part is
    #                 pre-halved so accumulation can use d = 2*cos directly.
    #         [36:39] 1 / bound per channel.
    # x_ref : (3, SUB, LANES) f32   raw points, channel-major, lane-dense
    # o_ref : (SUB, LANES) f32
    lanes = o_ref.shape[-1]
    n_chunks = lanes // chunk_lanes
    inv_gamma = 1.0 / gamma

    def compute_chunk(j):
        off = pl.multiple_of(j * chunk_lanes, chunk_lanes)
        ya = jnp.zeros((SUB, chunk_lanes), jnp.float32)   # sin partial accumulator
        yb = jnp.zeros((SUB, chunk_lanes), jnp.float32)   # cos partial (uses d = 2cos)
        for ch in range(3):
            # normalization fused in-kernel (3 VPU muls/point)
            xc = x_ref[ch, :, pl.ds(off, chunk_lanes)] * w_ref[ENC_DIM + ch]
            s = jnp.sin(xc)                 # base band only (transcendental)
            d = 2.0 * jnp.cos(xc)           # d_k = 2 * cos(2^k x)
            for k in range(n_freqs):
                ya = ya + w_ref[6 * k + ch] * s          # w_sin * sin
                yb = yb + w_ref[6 * k + 3 + ch] * d      # (w_cos/2) * 2cos
                if k + 1 < n_freqs:                      # 3-op recurrence (VPU)
                    s, d = s * d, d * d - 2.0
        y = ya + yb
        # DReLU(gamma): where(y < g, g * exp(y/g - 1), y)
        o_ref[:, pl.ds(off, chunk_lanes)] = jnp.where(
            y < gamma, gamma * jnp.exp(y * inv_gamma - 1.0), y)

    if n_chunks == 1:
        compute_chunk(0)
    else:
        def body(j, carry):
            compute_chunk(j)
            return carry
        lax.fori_loop(0, n_chunks, body, 0, unroll=False)


# ----------------------------- wrapper --------------------------------------
def one_layer_mlp(points, weight, bound):
    """points: (N, 3) f32, weight: (OUT_DIM, ENC_DIM) f32, bound: (3,) f32."""
    n = points.shape[0]
    tile = _choose_tile(n)
    lanes = tile // SUB
    chunk_lanes = min(CHUNK_LANES, lanes)
    n_pad = int(pl.cdiv(n, tile)) * tile

    # layout plumbing only: channel-major + pad; normalization moved into kernel
    xt = points.astype(jnp.float32).T                        # (3, N)
    if n_pad != n:
        xt = jnp.pad(xt, ((0, 0), (0, n_pad - n)))
    x_tiles = xt.reshape(3, SUB, n_pad // SUB)               # point p -> (p // L, p % L)

    # SMEM scalar table: weights (cos half pre-halved for d = 2cos) + inv_bound
    w = weight.astype(jnp.float32).reshape(N_FREQS, 2, 3)
    w = w.at[:, 1, :].multiply(0.5)
    w_tbl = jnp.concatenate(
        [w.reshape(-1), 1.0 / bound.astype(jnp.float32).reshape(-1)])   # (39,)

    kernel = functools.partial(one_layer_mlp_kernel, n_freqs=N_FREQS,
                               gamma=GAMMA, chunk_lanes=chunk_lanes)

    out = pl.pallas_call(
        kernel,
        out_shape=jax.ShapeDtypeStruct((SUB, n_pad // SUB), jnp.float32),
        grid_spec=pltpu.PrefetchScalarGridSpec(
            num_scalar_prefetch=1,                            # w_tbl -> SMEM once
            grid=(n_pad // tile,),
            in_specs=[
                pl.BlockSpec((3, SUB, lanes), lambda i, wt: (0, 0, i)),  # point tile
            ],
            out_specs=pl.BlockSpec((SUB, lanes), lambda i, wt: (0, i)),  # dense slab
        ),
        compiler_params=pltpu.CompilerParams(
            dimension_semantics=("parallel",),
        ),
    )(w_tbl, x_tiles)

    # undo the (SUB, N/SUB) packing and drop padding -> (N, 1) like nn.Linear
    return out.reshape(n_pad)[:n].reshape(n, OUT_DIM)


# ------------------------ deterministic parameter init ----------------------
def init_weight(key):
    """Mimic nn.Linear default init, then apply the module's manual overrides:
       weight[:, :8] = 0 ; weight[:, 8] = 1."""
    bound_init = 1.0 / jnp.sqrt(jnp.float32(ENC_DIM))
    w = jax.random.uniform(key, (OUT_DIM, ENC_DIM), jnp.float32,
                           minval=-bound_init, maxval=bound_init)
    w = w.at[:, :8].set(0.0)
    w = w.at[:, 8].set(1.0)
    return w


# ------------------------------ reference -----------------------------------
def reference(points, weight, bound):
    x = points / bound[None, :]
    feats = []
    for k in range(N_FREQS):
        xk = x * (2.0 ** k)
        feats.append(jnp.sin(xk))
        feats.append(jnp.cos(xk))
    h = jnp.concatenate(feats, axis=-1)
    y = h @ weight.T
    return jnp.where(y < GAMMA, GAMMA * jnp.exp(y / GAMMA - 1.0), y)


# -------------------------------- main ---------------------------------------
if __name__ == "__main__":
    key = jax.random.PRNGKey(0)
    k_pts, k_w = jax.random.split(key)

    n_points = 4096                                  # small demo (2 grid steps)
    s_voxel = jnp.array([2.0, 2.0, 2.0], jnp.float32)
    bound = s_voxel / 2.0                            # nn.Parameter(sVoxel / 2)

    points = jax.random.uniform(k_pts, (n_points, 3), jnp.float32,
                                minval=-1.0, maxval=1.0)
    weight = init_weight(k_w)

    out = one_layer_mlp(points, weight, bound)
    out = jax.block_until_ready(out)

    ref = reference(points, weight, bound)
    assert out.shape == (n_points, OUT_DIM)
    # 1e-4 tolerance: the 2cos recurrence drifts a few ulps vs direct sin/cos
    assert jnp.allclose(out, ref, atol=1e-4, rtol=1e-4), "mismatch vs reference"

    print("KERNEL_OK")
</pallas_src>

<mosaic_0001>
module attributes {stable_mosaic.version = 11 : i64} {
  func.func @one_layer_mlp_kernel(%arg0: i32, %arg1: memref<39xf32, #tpu.memory_space<smem>>, %arg2: memref<3x8x256xf32, #tpu.memory_space<vmem>>, %arg3: memref<8x256xf32, #tpu.memory_space<vmem>>) attributes {dimension_semantics = [#tpu.dimension_semantics<parallel>], iteration_bounds = array<i64: 2>, scalar_prefetch = 1 : i64, scratch_operands = 0 : i64, tpu.core_type = #tpu.core_type<tc>, window_params = [{transform_indices = @transform_0, window_bounds = array<i64: 3, 8, 256>}, {transform_indices = @transform_1, window_bounds = array<i64: 8, 256>}]} {
    %c0_i32 = arith.constant 0 : i32
    %0 = tpu.assume_multiple %c0_i32, 256 : i32
    %cst = arith.constant 0.000000e+00 : f32
    %1 = vector.broadcast %cst : f32 to vector<8x256xf32>
    %cst_0 = arith.constant 0.000000e+00 : f32
    %2 = vector.broadcast %cst_0 : f32 to vector<8x256xf32>
    %c0 = arith.constant 0 : index
    %c0_1 = arith.constant 0 : index
    %3 = arith.index_cast %0 : i32 to index
    %4 = vector.load %arg2[%c0, %c0_1, %3] : memref<3x8x256xf32, #tpu.memory_space<vmem>>, vector<1x8x256xf32>
    %5 = vector.shape_cast %4 : vector<1x8x256xf32> to vector<8x256xf32>
    %c36 = arith.constant 36 : index
    %6 = memref.load %arg1[%c36] : memref<39xf32, #tpu.memory_space<smem>>
    %7 = vector.broadcast %6 : f32 to vector<8x256xf32>
    %8 = arith.mulf %5, %7 : vector<8x256xf32>
    %9 = math.sin %8 : vector<8x256xf32>
    %10 = math.cos %8 : vector<8x256xf32>
    %cst_2 = arith.constant 2.000000e+00 : f32
    %11 = vector.broadcast %cst_2 : f32 to vector<8x256xf32>
    %12 = arith.mulf %11, %10 : vector<8x256xf32>
    %c0_3 = arith.constant 0 : index
    %13 = memref.load %arg1[%c0_3] : memref<39xf32, #tpu.memory_space<smem>>
    %14 = vector.broadcast %13 : f32 to vector<8x256xf32>
    %15 = arith.mulf %14, %9 : vector<8x256xf32>
    %16 = arith.addf %1, %15 : vector<8x256xf32>
    %c3 = arith.constant 3 : index
    %17 = memref.load %arg1[%c3] : memref<39xf32, #tpu.memory_space<smem>>
    %18 = vector.broadcast %17 : f32 to vector<8x256xf32>
    %19 = arith.mulf %18, %12 : vector<8x256xf32>
    %20 = arith.addf %2, %19 : vector<8x256xf32>
    %21 = arith.mulf %9, %12 : vector<8x256xf32>
    %22 = arith.mulf %12, %12 : vector<8x256xf32>
    %cst_4 = arith.constant 2.000000e+00 : f32
    %23 = vector.broadcast %cst_4 : f32 to vector<8x256xf32>
    %24 = arith.subf %22, %23 : vector<8x256xf32>
    %c6 = arith.constant 6 : index
    %25 = memref.load %arg1[%c6] : memref<39xf32, #tpu.memory_space<smem>>
    %26 = vector.broadcast %25 : f32 to vector<8x256xf32>
    %27 = arith.mulf %26, %21 : vector<8x256xf32>
    %28 = arith.addf %16, %27 : vector<8x256xf32>
    %c9 = arith.constant 9 : index
    %29 = memref.load %arg1[%c9] : memref<39xf32, #tpu.memory_space<smem>>
    %30 = vector.broadcast %29 : f32 to vector<8x256xf32>
    %31 = arith.mulf %30, %24 : vector<8x256xf32>
    %32 = arith.addf %20, %31 : vector<8x256xf32>
    %33 = arith.mulf %21, %24 : vector<8x256xf32>
    %34 = arith.mulf %24, %24 : vector<8x256xf32>
    %cst_5 = arith.constant 2.000000e+00 : f32
    %35 = vector.broadcast %cst_5 : f32 to vector<8x256xf32>
    %36 = arith.subf %34, %35 : vector<8x256xf32>
    %c12 = arith.constant 12 : index
    %37 = memref.load %arg1[%c12] : memref<39xf32, #tpu.memory_space<smem>>
    %38 = vector.broadcast %37 : f32 to vector<8x256xf32>
    %39 = arith.mulf %38, %33 : vector<8x256xf32>
    %40 = arith.addf %28, %39 : vector<8x256xf32>
    %c15 = arith.constant 15 : index
    %41 = memref.load %arg1[%c15] : memref<39xf32, #tpu.memory_space<smem>>
    %42 = vector.broadcast %41 : f32 to vector<8x256xf32>
    %43 = arith.mulf %42, %36 : vector<8x256xf32>
    %44 = arith.addf %32, %43 : vector<8x256xf32>
    %45 = arith.mulf %33, %36 : vector<8x256xf32>
    %46 = arith.mulf %36, %36 : vector<8x256xf32>
    %cst_6 = arith.constant 2.000000e+00 : f32
    %47 = vector.broadcast %cst_6 : f32 to vector<8x256xf32>
    %48 = arith.subf %46, %47 : vector<8x256xf32>
    %c18 = arith.constant 18 : index
    %49 = memref.load %arg1[%c18] : memref<39xf32, #tpu.memory_space<smem>>
    %50 = vector.broadcast %49 : f32 to vector<8x256xf32>
    %51 = arith.mulf %50, %45 : vector<8x256xf32>
    %52 = arith.addf %40, %51 : vector<8x256xf32>
    %c21 = arith.constant 21 : index
    %53 = memref.load %arg1[%c21] : memref<39xf32, #tpu.memory_space<smem>>
    %54 = vector.broadcast %53 : f32 to vector<8x256xf32>
    %55 = arith.mulf %54, %48 : vector<8x256xf32>
    %56 = arith.addf %44, %55 : vector<8x256xf32>
    %57 = arith.mulf %45, %48 : vector<8x256xf32>
    %58 = arith.mulf %48, %48 : vector<8x256xf32>
    %cst_7 = arith.constant 2.000000e+00 : f32
    %59 = vector.broadcast %cst_7 : f32 to vector<8x256xf32>
    %60 = arith.subf %58, %59 : vector<8x256xf32>
    %c24 = arith.constant 24 : index
    %61 = memref.load %arg1[%c24] : memref<39xf32, #tpu.memory_space<smem>>
    %62 = vector.broadcast %61 : f32 to vector<8x256xf32>
    %63 = arith.mulf %62, %57 : vector<8x256xf32>
    %64 = arith.addf %52, %63 : vector<8x256xf32>
    %c27 = arith.constant 27 : index
    %65 = memref.load %arg1[%c27] : memref<39xf32, #tpu.memory_space<smem>>
    %66 = vector.broadcast %65 : f32 to vector<8x256xf32>
    %67 = arith.mulf %66, %60 : vector<8x256xf32>
    %68 = arith.addf %56, %67 : vector<8x256xf32>
    %69 = arith.mulf %57, %60 : vector<8x256xf32>
    %70 = arith.mulf %60, %60 : vector<8x256xf32>
    %cst_8 = arith.constant 2.000000e+00 : f32
    %71 = vector.broadcast %cst_8 : f32 to vector<8x256xf32>
    %72 = arith.subf %70, %71 : vector<8x256xf32>
    %c30 = arith.constant 30 : index
    %73 = memref.load %arg1[%c30] : memref<39xf32, #tpu.memory_space<smem>>
    %74 = vector.broadcast %73 : f32 to vector<8x256xf32>
    %75 = arith.mulf %74, %69 : vector<8x256xf32>
    %76 = arith.addf %64, %75 : vector<8x256xf32>
    %c33 = arith.constant 33 : index
    %77 = memref.load %arg1[%c33] : memref<39xf32, #tpu.memory_space<smem>>
    %78 = vector.broadcast %77 : f32 to vector<8x256xf32>
    %79 = arith.mulf %78, %72 : vector<8x256xf32>
    %80 = arith.addf %68, %79 : vector<8x256xf32>
    %c1 = arith.constant 1 : index
    %c0_9 = arith.constant 0 : index
    %81 = arith.index_cast %0 : i32 to index
    %82 = vector.load %arg2[%c1, %c0_9, %81] : memref<3x8x256xf32, #tpu.memory_space<vmem>>, vector<1x8x256xf32>
    %83 = vector.shape_cast %82 : vector<1x8x256xf32> to vector<8x256xf32>
    %c37 = arith.constant 37 : index
    %84 = memref.load %arg1[%c37] : memref<39xf32, #tpu.memory_space<smem>>
    %85 = vector.broadcast %84 : f32 to vector<8x256xf32>
    %86 = arith.mulf %83, %85 : vector<8x256xf32>
    %87 = math.sin %86 : vector<8x256xf32>
    %88 = math.cos %86 : vector<8x256xf32>
    %cst_10 = arith.constant 2.000000e+00 : f32
    %89 = vector.broadcast %cst_10 : f32 to vector<8x256xf32>
    %90 = arith.mulf %89, %88 : vector<8x256xf32>
    %c1_11 = arith.constant 1 : index
    %91 = memref.load %arg1[%c1_11] : memref<39xf32, #tpu.memory_space<smem>>
    %92 = vector.broadcast %91 : f32 to vector<8x256xf32>
    %93 = arith.mulf %92, %87 : vector<8x256xf32>
    %94 = arith.addf %76, %93 : vector<8x256xf32>
    %c4 = arith.constant 4 : index
    %95 = memref.load %arg1[%c4] : memref<39xf32, #tpu.memory_space<smem>>
    %96 = vector.broadcast %95 : f32 to vector<8x256xf32>
    %97 = arith.mulf %96, %90 : vector<8x256xf32>
    %98 = arith.addf %80, %97 : vector<8x256xf32>
    %99 = arith.mulf %87, %90 : vector<8x256xf32>
    %100 = arith.mulf %90, %90 : vector<8x256xf32>
    %cst_12 = arith.constant 2.000000e+00 : f32
    %101 = vector.broadcast %cst_12 : f32 to vector<8x256xf32>
    %102 = arith.subf %100, %101 : vector<8x256xf32>
    %c7 = arith.constant 7 : index
    %103 = memref.load %arg1[%c7] : memref<39xf32, #tpu.memory_space<smem>>
    %104 = vector.broadcast %103 : f32 to vector<8x256xf32>
    %105 = arith.mulf %104, %99 : vector<8x256xf32>
    %106 = arith.addf %94, %105 : vector<8x256xf32>
    %c10 = arith.constant 10 : index
    %107 = memref.load %arg1[%c10] : memref<39xf32, #tpu.memory_space<smem>>
    %108 = vector.broadcast %107 : f32 to vector<8x256xf32>
    %109 = arith.mulf %108, %102 : vector<8x256xf32>
    %110 = arith.addf %98, %109 : vector<8x256xf32>
    %111 = arith.mulf %99, %102 : vector<8x256xf32>
    %112 = arith.mulf %102, %102 : vector<8x256xf32>
    %cst_13 = arith.constant 2.000000e+00 : f32
    %113 = vector.broadcast %cst_13 : f32 to vector<8x256xf32>
    %114 = arith.subf %112, %113 : vector<8x256xf32>
    %c13 = arith.constant 13 : index
    %115 = memref.load %arg1[%c13] : memref<39xf32, #tpu.memory_space<smem>>
    %116 = vector.broadcast %115 : f32 to vector<8x256xf32>
    %117 = arith.mulf %116, %111 : vector<8x256xf32>
    %118 = arith.addf %106, %117 : vector<8x256xf32>
    %c16 = arith.constant 16 : index
    %119 = memref.load %arg1[%c16] : memref<39xf32, #tpu.memory_space<smem>>
    %120 = vector.broadcast %119 : f32 to vector<8x256xf32>
    %121 = arith.mulf %120, %114 : vector<8x256xf32>
    %122 = arith.addf %110, %121 : vector<8x256xf32>
    %123 = arith.mulf %111, %114 : vector<8x256xf32>
    %124 = arith.mulf %114, %114 : vector<8x256xf32>
    %cst_14 = arith.constant 2.000000e+00 : f32
    %125 = vector.broadcast %cst_14 : f32 to vector<8x256xf32>
    %126 = arith.subf %124, %125 : vector<8x256xf32>
    %c19 = arith.constant 19 : index
    %127 = memref.load %arg1[%c19] : memref<39xf32, #tpu.memory_space<smem>>
    %128 = vector.broadcast %127 : f32 to vector<8x256xf32>
    %129 = arith.mulf %128, %123 : vector<8x256xf32>
    %130 = arith.addf %118, %129 : vector<8x256xf32>
    %c22 = arith.constant 22 : index
    %131 = memref.load %arg1[%c22] : memref<39xf32, #tpu.memory_space<smem>>
    %132 = vector.broadcast %131 : f32 to vector<8x256xf32>
    %133 = arith.mulf %132, %126 : vector<8x256xf32>
    %134 = arith.addf %122, %133 : vector<8x256xf32>
    %135 = arith.mulf %123, %126 : vector<8x256xf32>
    %136 = arith.mulf %126, %126 : vector<8x256xf32>
    %cst_15 = arith.constant 2.000000e+00 : f32
    %137 = vector.broadcast %cst_15 : f32 to vector<8x256xf32>
    %138 = arith.subf %136, %137 : vector<8x256xf32>
    %c25 = arith.constant 25 : index
    %139 = memref.load %arg1[%c25] : memref<39xf32, #tpu.memory_space<smem>>
    %140 = vector.broadcast %139 : f32 to vector<8x256xf32>
    %141 = arith.mulf %140, %135 : vector<8x256xf32>
    %142 = arith.addf %130, %141 : vector<8x256xf32>
    %c28 = arith.constant 28 : index
    %143 = memref.load %arg1[%c28] : memref<39xf32, #tpu.memory_space<smem>>
    %144 = vector.broadcast %143 : f32 to vector<8x256xf32>
    %145 = arith.mulf %144, %138 : vector<8x256xf32>
    %146 = arith.addf %134, %145 : vector<8x256xf32>
    %147 = arith.mulf %135, %138 : vector<8x256xf32>
    %148 = arith.mulf %138, %138 : vector<8x256xf32>
    %cst_16 = arith.constant 2.000000e+00 : f32
    %149 = vector.broadcast %cst_16 : f32 to vector<8x256xf32>
    %150 = arith.subf %148, %149 : vector<8x256xf32>
    %c31 = arith.constant 31 : index
    %151 = memref.load %arg1[%c31] : memref<39xf32, #tpu.memory_space<smem>>
    %152 = vector.broadcast %151 : f32 to vector<8x256xf32>
    %153 = arith.mulf %152, %147 : vector<8x256xf32>
    %154 = arith.addf %142, %153 : vector<8x256xf32>
    %c34 = arith.constant 34 : index
    %155 = memref.load %arg1[%c34] : memref<39xf32, #tpu.memory_space<smem>>
    %156 = vector.broadcast %155 : f32 to vector<8x256xf32>
    %157 = arith.mulf %156, %150 : vector<8x256xf32>
    %158 = arith.addf %146, %157 : vector<8x256xf32>
    %c2 = arith.constant 2 : index
    %c0_17 = arith.constant 0 : index
    %159 = arith.index_cast %0 : i32 to index
    %160 = vector.load %arg2[%c2, %c0_17, %159] : memref<3x8x256xf32, #tpu.memory_space<vmem>>, vector<1x8x256xf32>
    %161 = vector.shape_cast %160 : vector<1x8x256xf32> to vector<8x256xf32>
    %c38 = arith.constant 38 : index
    %162 = memref.load %arg1[%c38] : memref<39xf32, #tpu.memory_space<smem>>
    %163 = vector.broadcast %162 : f32 to vector<8x256xf32>
    %164 = arith.mulf %161, %163 : vector<8x256xf32>
    %165 = math.sin %164 : vector<8x256xf32>
    %166 = math.cos %164 : vector<8x256xf32>
    %cst_18 = arith.constant 2.000000e+00 : f32
    %167 = vector.broadcast %cst_18 : f32 to vector<8x256xf32>
    %168 = arith.mulf %167, %166 : vector<8x256xf32>
    %c2_19 = arith.constant 2 : index
    %169 = memref.load %arg1[%c2_19] : memref<39xf32, #tpu.memory_space<smem>>
    %170 = vector.broadcast %169 : f32 to vector<8x256xf32>
    %171 = arith.mulf %170, %165 : vector<8x256xf32>
    %172 = arith.addf %154, %171 : vector<8x256xf32>
    %c5 = arith.constant 5 : index
    %173 = memref.load %arg1[%c5] : memref<39xf32, #tpu.memory_space<smem>>
    %174 = vector.broadcast %173 : f32 to vector<8x256xf32>
    %175 = arith.mulf %174, %168 : vector<8x256xf32>
    %176 = arith.addf %158, %175 : vector<8x256xf32>
    %177 = arith.mulf %165, %168 : vector<8x256xf32>
    %178 = arith.mulf %168, %168 : vector<8x256xf32>
    %cst_20 = arith.constant 2.000000e+00 : f32
    %179 = vector.broadcast %cst_20 : f32 to vector<8x256xf32>
    %180 = arith.subf %178, %179 : vector<8x256xf32>
    %c8 = arith.constant 8 : index
    %181 = memref.load %arg1[%c8] : memref<39xf32, #tpu.memory_space<smem>>
    %182 = vector.broadcast %181 : f32 to vector<8x256xf32>
    %183 = arith.mulf %182, %177 : vector<8x256xf32>
    %184 = arith.addf %172, %183 : vector<8x256xf32>
    %c11 = arith.constant 11 : index
    %185 = memref.load %arg1[%c11] : memref<39xf32, #tpu.memory_space<smem>>
    %186 = vector.broadcast %185 : f32 to vector<8x256xf32>
    %187 = arith.mulf %186, %180 : vector<8x256xf32>
    %188 = arith.addf %176, %187 : vector<8x256xf32>
    %189 = arith.mulf %177, %180 : vector<8x256xf32>
    %190 = arith.mulf %180, %180 : vector<8x256xf32>
    %cst_21 = arith.constant 2.000000e+00 : f32
    %191 = vector.broadcast %cst_21 : f32 to vector<8x256xf32>
    %192 = arith.subf %190, %191 : vector<8x256xf32>
    %c14 = arith.constant 14 : index
    %193 = memref.load %arg1[%c14] : memref<39xf32, #tpu.memory_space<smem>>
    %194 = vector.broadcast %193 : f32 to vector<8x256xf32>
    %195 = arith.mulf %194, %189 : vector<8x256xf32>
    %196 = arith.addf %184, %195 : vector<8x256xf32>
    %c17 = arith.constant 17 : index
    %197 = memref.load %arg1[%c17] : memref<39xf32, #tpu.memory_space<smem>>
    %198 = vector.broadcast %197 : f32 to vector<8x256xf32>
    %199 = arith.mulf %198, %192 : vector<8x256xf32>
    %200 = arith.addf %188, %199 : vector<8x256xf32>
    %201 = arith.mulf %189, %192 : vector<8x256xf32>
    %202 = arith.mulf %192, %192 : vector<8x256xf32>
    %cst_22 = arith.constant 2.000000e+00 : f32
    %203 = vector.broadcast %cst_22 : f32 to vector<8x256xf32>
    %204 = arith.subf %202, %203 : vector<8x256xf32>
    %c20 = arith.constant 20 : index
    %205 = memref.load %arg1[%c20] : memref<39xf32, #tpu.memory_space<smem>>
    %206 = vector.broadcast %205 : f32 to vector<8x256xf32>
    %207 = arith.mulf %206, %201 : vector<8x256xf32>
    %208 = arith.addf %196, %207 : vector<8x256xf32>
    %c23 = arith.constant 23 : index
    %209 = memref.load %arg1[%c23] : memref<39xf32, #tpu.memory_space<smem>>
    %210 = vector.broadcast %209 : f32 to vector<8x256xf32>
    %211 = arith.mulf %210, %204 : vector<8x256xf32>
    %212 = arith.addf %200, %211 : vector<8x256xf32>
    %213 = arith.mulf %201, %204 : vector<8x256xf32>
    %214 = arith.mulf %204, %204 : vector<8x256xf32>
    %cst_23 = arith.constant 2.000000e+00 : f32
    %215 = vector.broadcast %cst_23 : f32 to vector<8x256xf32>
    %216 = arith.subf %214, %215 : vector<8x256xf32>
    %c26 = arith.constant 26 : index
    %217 = memref.load %arg1[%c26] : memref<39xf32, #tpu.memory_space<smem>>
    %218 = vector.broadcast %217 : f32 to vector<8x256xf32>
    %219 = arith.mulf %218, %213 : vector<8x256xf32>
    %220 = arith.addf %208, %219 : vector<8x256xf32>
    %c29 = arith.constant 29 : index
    %221 = memref.load %arg1[%c29] : memref<39xf32, #tpu.memory_space<smem>>
    %222 = vector.broadcast %221 : f32 to vector<8x256xf32>
    %223 = arith.mulf %222, %216 : vector<8x256xf32>
    %224 = arith.addf %212, %223 : vector<8x256xf32>
    %225 = arith.mulf %213, %216 : vector<8x256xf32>
    %226 = arith.mulf %216, %216 : vector<8x256xf32>
    %cst_24 = arith.constant 2.000000e+00 : f32
    %227 = vector.broadcast %cst_24 : f32 to vector<8x256xf32>
    %228 = arith.subf %226, %227 : vector<8x256xf32>
    %c32 = arith.constant 32 : index
    %229 = memref.load %arg1[%c32] : memref<39xf32, #tpu.memory_space<smem>>
    %230 = vector.broadcast %229 : f32 to vector<8x256xf32>
    %231 = arith.mulf %230, %225 : vector<8x256xf32>
    %232 = arith.addf %220, %231 : vector<8x256xf32>
    %c35 = arith.constant 35 : index
    %233 = memref.load %arg1[%c35] : memref<39xf32, #tpu.memory_space<smem>>
    %234 = vector.broadcast %233 : f32 to vector<8x256xf32>
    %235 = arith.mulf %234, %228 : vector<8x256xf32>
    %236 = arith.addf %224, %235 : vector<8x256xf32>
    %237 = arith.addf %232, %236 : vector<8x256xf32>
    %cst_25 = arith.constant 5.000000e-01 : f32
    %238 = vector.broadcast %cst_25 : f32 to vector<8x256xf32>
    %239 = arith.cmpf olt, %237, %238 : vector<8x256xf32>
    %cst_26 = arith.constant 2.000000e+00 : f32
    %240 = vector.broadcast %cst_26 : f32 to vector<8x256xf32>
    %241 = arith.mulf %237, %240 : vector<8x256xf32>
    %cst_27 = arith.constant 1.000000e+00 : f32
    %242 = vector.broadcast %cst_27 : f32 to vector<8x256xf32>
    %243 = arith.subf %241, %242 : vector<8x256xf32>
    %244 = math.exp %243 : vector<8x256xf32>
    %cst_28 = arith.constant 5.000000e-01 : f32
    %245 = vector.broadcast %cst_28 : f32 to vector<8x256xf32>
    %246 = arith.mulf %245, %244 : vector<8x256xf32>
    %247 = arith.select %239, %246, %237 : vector<8x256xi1>, vector<8x256xf32>
    %c0_29 = arith.constant 0 : index
    %248 = arith.index_cast %0 : i32 to index
    %249 = vector.load %arg3[%c0_29, %248] : memref<8x256xf32, #tpu.memory_space<vmem>>, vector<8x256xf32>
    tpu.vector_store %arg3[%c0_29, %248], %247 {strides = array<i32>} : memref<8x256xf32, #tpu.memory_space<vmem>>, vector<8x256xf32>,
    return
  }
  func.func @transform_0(%arg0: i32, %arg1: memref<39xf32, #tpu.memory_space<smem>>) -> (i32, i32, i32) {
    %c0_i32 = arith.constant 0 : i32
    %c0_i32_0 = arith.constant 0 : i32
    %c0_i32_1 = arith.constant 0 : i32
    return %c0_i32, %c0_i32_0, %arg0 : i32, i32, i32
  }
  func.func @transform_1(%arg0: i32, %arg1: memref<39xf32, #tpu.memory_space<smem>>) -> (i32, i32) {
    %c0_i32 = arith.constant 0 : i32
    %c0_i32_0 = arith.constant 0 : i32
    return %c0_i32, %arg0 : i32, i32
  }
}

</mosaic_0001>

<bundles_post_ra>
// kernel: tpu_custom_call.1
= control target key start
LH: loop header
LB: loop body
LE: loop exit
PB: predicated region body
PF: predicated region fallthrough
CT: control target
= control target key end

     0   :  { %s3342_s0 = inlined_call_operand.hbm [shape: f32[39], index: 0, kind: input, shape index: {}]   ;;  %s3343_s1 = inlined_call_operand.hbm [shape: f32[3,8,512], index: 1, kind: input, shape index: {}]   ;;  %s3344_s2 = inlined_call_operand.hbm [shape: f32[8,512], index: 2, kind: output, shape index: {}]  }
   0x1   :  { %s2071_s11 = scalar_lea.hbm %s3342_s0, 16 }
   0x2   :  { %p2072_p0 = scmp.ne.s32.totalorder %s3342_s0, %s2071_s11  ;;  %p2075_p1 = scmp.lt.u32.totalorder %s2071_s11, %s3342_s0 }
   0x4   :  { %p2077_p2 = pnand %p2075_p1, %p2072_p0 }
   0x6   :  { %2080 = shalt.err (!%p2077_p2)  }
   0x7   :  { %s2181_s16 = smov [#allocation3]  }
   0x8   :  { %8 = dma.hbm_to_smem %s3342_s0, 16, %s2181_s16, [#allocation2] }
   0x9   :  { %2155 = dma.done.wait [#allocation2], 16 }
   0xa   :  { %2156 = vsyncadd [#allocation2], 4294967280 }
   0xb   :  { %10 = sfence }
   0xc   :  { %11 = vsyncpa [#allocation5], 0 }
   0xd   :  { %13 = vsyncpa [#allocation5 + $0x1], 0 }
   0xe   :  { %14 = vsyncpa [#allocation6], 0 }
   0xf   :  { %16 = vsyncpa [#allocation6 + $0x1], 0  ;;  %s2220_s19 = smov 0   ;;  %s2222_s20 = smov 0  }
  0x10   :  { %s2224_s21 = smov 0   ;;  %s2226_s22 = smov 0  }
  0x11 LB: > { %s2241_s0 = sadd.s32 4294967295, %s2179_s22   ;;  %s1825_s23 = sadd.s32 4294967294, %s2179_s22   ;;  %s2179_s22 = sphi %s2226_s22, %s3369_s22   ;;  %s2175_s21 = sphi %s2224_s21, %s3368_s21   ;;  %s2171_s20 = sphi %s2222_s20, %s3367_s20   ;;  %s2167_s19 = sphi %s2220_s19, %s3366_s19  }
  0x12   : > { %s2245_s24 = sadd.s32 1, %s2179_s22   ;;  %s29_s25 = sadd.s32 1, %s2175_s21 }
  0x13   : > { %s26_s26 = ssub.s32 %s2179_s22, %s2245_s24  ;;  %p36_p3 = scmp.ne.s32.totalorder %s2175_s21, %s2171_s20 }
  0x14   : > { %p27_p4 = scmp.eq.s32.totalorder %s26_s26, 0  ;;  %p37_p5 = scmp.eq.s32.totalorder %s2179_s22, 0 }
  0x15   : > { %p42_p6 = scmp.ne.s32.totalorder %s2171_s20, %s2167_s19  ;;  %p43_p7 = scmp.eq.s32.totalorder %s2241_s0, 0 }
  0x16   : > { %s2257_s27 = scalar_select %p27_p4, %s2175_s21, %s29_s25  }
  0x17   : > { %p38_p8 = por %p37_p5, %p36_p3  ;;  %p2259_p9 = por %p43_p7, %p42_p6 }
  0x18   : > { %p66_p10 = scmp.eq.s32.totalorder %s2241_s0, 1  ;;  %p72_p11 = scmp.eq.s32.totalorder %s1825_s23, 1 }
  0x19   : > { %p1999_p13 = scmp.lt.s32.totalorder %s2179_s22, 2  ;;  %s92_s3 = sand.u32 1, %s2175_s21  }
  0x1a   : > { %p2266_p0 = por %p66_p10, %p36_p3  ;;  %p2270_p1 = por %p72_p11, %p42_p6 }
  0x1b   : > { %s1959_s4 = sshll.u32 %s2179_s22, 8  ;;  %s1961_s5 = smul.u32 48, %s92_s3 }
  0x1c   : > { %s3347_s29 = scalar_select %p2266_p0, 1, 0 }
  0x1d   : > { %s3348_s30 = scalar_select %p2270_p1, 1, 0 }
  0x1e   : > { %s2279_s8 = scalar_lea.hbm %s3343_s1, %s1959_s4  ;;  %p2281_p2 = pnand %p1999_p13, %p38_p8 }
  0x1f   : > { %s96_s10 = scalar_lea.vmem [#allocation4], %s1961_s5  ;;  %s2288_s12 = scalar_lea.sflag [#allocation5], %s92_s3 }
  0x20   : > { %s103_s11 = sshll.u32 %s96_s10, 4  ;;  %s2081_s13 = scalar_lea.hbm %s2279_s8, 768  ;;  %s2285_s11 = int_to_ptr.vmem [resolvable:$true] %s103_s11 }
  0x21   : > { %p2082_p4 = scmp.ne.s32.totalorder %s2279_s8, %s2081_s13  ;;  %p2083_p5 = pneg %p2281_p2 }
  0x22   : > { %s2086_s16 = scalar_lea.hbm %s3343_s1, 1536  ;;  %p2087_p8 = scmp.lt.u32.totalorder %s2279_s8, %s3343_s1 }
  0x23   : > { %p2084_p6 = pnand %p2083_p5, %p2082_p4  ;;  %p2088_p10 = scmp.lt.u32.totalorder %s2086_s16, %s2081_s13 }
  0x24   : > { %p2090_p13 = scmp.lt.u32.totalorder %s2081_s13, %s2279_s8 }
  0x25   : > { %p2085_p7 = pneg %p2084_p6  ;;  %p2089_p11 = por %p2088_p10, %p2087_p8 }
  0x27   : > { %p2091_p12 = por %p2090_p13, %p2089_p11 }
  0x29   : > { %p2092_p3 = pnand %p2091_p12, %p2085_p7 }
  0x2b   : > { %2095 = shalt.err (!%p2092_p3)
}
  0x2c   : > { %s2096_s23 = scalar_lea.vmem %s2285_s11, 768  ;;  %s2182_s25 = smov [#allocation4]  }
  0x2d   : > { %p2097_p4 = scmp.ne.s32.totalorder %s2285_s11, %s2096_s23  ;;  %s2101_s26 = sshll.u32 %s2182_s25, 4  ;;  %s2102_s26 = int_to_ptr.vmem [resolvable:$false] %s2101_s26 }
  0x2e   : > { %s2103_s3 = scalar_lea.vmem %s2102_s26, 1536  ;;  %p2104_p0 = scmp.lt.s32.totalorder %s2285_s11, %s2102_s26 }
  0x2f   : > { %p2099_p6 = pnand %p2097_p4, %p2083_p5  ;;  %p2105_p8 = scmp.lt.s32.totalorder %s2103_s3, %s2096_s23 }
  0x31   : > { %p2100_p1 = pneg %p2099_p6  ;;  %p2106_p10 = por %p2105_p8, %p2104_p0 }
  0x33   : > { %p2107_p11 = pnand %p2106_p10, %p2100_p1 }
  0x35   : > { %2110 = shalt.err (!%p2107_p11)
}
  0x36   : > { %s2183_s4 = smov 512   ;;  %s2184_s5 = smov 256  }
  0x37   : > { %s2185_s6 = smov 16   ;;  %p111_p12 = scmp.lt.s32.totalorder %s2179_s22, 3 }
  0x38   : > { %1994 = dma.hbm_to_vmem [thread:$0]  (!%p2281_p2), %s2279_s8, 768, %s2285_s11, %s2288_s12, %s2183_s4, %s2184_s5, %s2185_s6  }
  0x39   : > { %p3350_p3 = scmp.ge.s32.totalorder %s2179_s22, 1 }
  0x3b   : > { %p112_p5 = pnand %p3350_p3, %p111_p12 }
  0x3c   : > { %s2320_s7 = sand.u32 (!%p112_p5), 1, %s2171_s20  }
  0x3d   : > { %115 = sbr.rel (%p112_p5) target bundleno = 365 (0x16d), region = 24  ;;  %s118_s13 = scalar_lea.sflag (!%p112_p5), [#allocation5], %s2320_s7 }
  0x3e   : > { %s1962_s10 = smul.u32 (!%p112_p5), 48, %s2320_s7 }
  0x40   : > { %s2324_s14 = scalar_lea.vmem (!%p112_p5), [#allocation4], %s1962_s10 }
  0x44   : > { %2158 = dma.done.wait (%p2259_p9), %s118_s13, 768  }
  0x45   : > { %2160 = vsyncadd (%p2259_p9), %s118_s13, 4294966528  ;;  %s1832_s8 = sld [smem:[#allocation3 + $0x24]]  ;;  %v142_v0 = vld [vmem:[%s2324_s14] sm:$0xff]  ;;  %v143_v1 = vld [vmem:[%s2324_s14 + $0x8] sm:$0xff]  ;;  %s2338_s9 = sld [smem:[#allocation3 + $0x25]] }
  0x46   : > { %v1870_v19 = vld [vmem:[%s2324_s14 + $0x10] sm:$0xff]  ;;  %v2186_v30 = vmov 683565275   ;;  %v2187_v32 = vmov 2475754826   ;;  %s2498_s28 = sld [smem:[#allocation3]] }
  0x47   : > { %v2188_v34 = vmov 2131351028   ;;  %v2189_v36 = vmov 2102212464   ;;  %v2190_v38 = vmov 920167782  }
  0x48   : > { %v2191_v46 = vmov 1326507024   ;;  %s2509_s11 = sld [smem:[#allocation3 + $0x3]]  ;;  %s2513_s12 = sld [smem:[#allocation3 + $0x6]] }
  0x49   : > { %s2515_s15 = sld [smem:[#allocation3 + $0x9]]  ;;  %s2521_s16 = sld [smem:[#allocation3 + $0xc]] }
  0x4a   : > { %s2523_s17 = sld [smem:[#allocation3 + $0xf]]  ;;  %s2528_s18 = sld [smem:[#allocation3 + $0x12]] }
  0x4b   : > { %v145_v2 = vstv %s1832_s8  ;;  %v672_v20 = vstv %s2338_s9  ;;  %s2530_s23 = sld [smem:[#allocation3 + $0x15]]  ;;  %s2533_s25 = sld [smem:[#allocation3 + $0x18]] }
  0x4c   : > { %v2332_v3 = vmul.f32 %v145_v2, %v142_v0  ;;  %v2334_v4 = vmul.f32 %v145_v2, %v143_v1  ;;  %v2354_v28 = vmul.f32 %v1870_v19, %v672_v20  ;;  %s2535_s26 = sld [smem:[#allocation3 + $0x1b]]  ;;  %s2540_s3 = sld [smem:[#allocation3 + $0x1e]] }
  0x4d   : > { %s2595_s4 = sld [smem:[#allocation3 + $0x21]]  ;;  %s2608_s5 = sld [smem:[#allocation3 + $0x26]] }
  0x4e   : > { %v148_v5 = vand.u32 2147483647, %v2332_v3  ;;  %v151_v6 = vand.u32 2139095040, %v2332_v3  ;;  %v252_v7 = vand.u32 2147483647, %v2334_v4  ;;  %v255_v8 = vand.u32 2139095040, %v2334_v4 }
  0x4f   : > { %vm150_vm14 = vcmp.lt.s32.totalorder %v2332_v3, 0  ;;  %s2657_s6 = sld [smem:[#allocation3 + $0x1]]  ;;  %s2671_s10 = sld [smem:[#allocation3 + $0x4]] }
  0x50   : > { %v152_v9 = vshrl.u32 %v151_v6, 23  ;;  %v155_v10 = vand.u32 8388607, %v148_v5  ;;  %v256_v11 = vshrl.u32 %v255_v8, 23  ;;  %v259_v12 = vand.u32 8388607, %v252_v7 }
  0x51   : > { %s2673_s13 = sld [smem:[#allocation3 + $0x7]]  ;;  %s2695_s8 = sld [smem:[#allocation3 + $0xa]] }
  0x52   : > { %v1833_v13 = vadd.s32 4294967169, %v152_v9  ;;  %v1837_v14 = vadd.s32 4294967169, %v256_v11  ;;  %v156_v16 = vor.u32 8388608, %v155_v10  ;;  %v260_v17 = vor.u32 8388608, %v259_v12  ;;  %s2697_s9 = sld [smem:[#allocation3 + $0xd]]  ;;  %p3363_p0 = scmp.ne.s32.totalorder %s3347_s29, 0 }
  0x54   : > { %v158_v15 = vadd.s32 1, %v1833_v13  ;;  %v262_v18 = vadd.s32 1, %v1837_v14  ;;  %v2348_v25 = vshll.u32 %v156_v16, 8  ;;  %v2350_v27 = vshll.u32 %v260_v17, 8 }
  0x56   : > { %vm159_vm0 = vcmp.gt.s32.totalorder %v158_v15, 0  ;;  %vm263_vm1 = vcmp.gt.s32.totalorder %v262_v18, 0 }
  0x57   : > { %v160_v21 = vsel %vm159_vm0, %v158_v15, 0  ;;  %v264_v24 = vsel %vm263_vm1, %v262_v18, 0 }
  0x58   : > { %v161_v22 = vshrl.u32 %v160_v21, 5  ;;  %v162_v23 = vand.u32 31, %v160_v21  ;;  %v266_v26 = vand.u32 31, %v264_v24  ;;  %v2361_v40 = vshrl.u32 %v264_v24, 5 }
  0x5a   : > { %v163_v29 = vsub.s32 32, %v162_v23  ;;  %v165_v31 = vshll.u32 %v2186_v30, %v162_v23  ;;  %v168_v33 = vshll.u32 %v2187_v32, %v162_v23  ;;  %v171_v35 = vshll.u32 %v2188_v34, %v162_v23 }
  0x5b   : > { %v174_v37 = vshll.u32 %v2189_v36, %v162_v23  ;;  %v177_v39 = vshll.u32 %v2190_v38, %v162_v23  ;;  %vm180_vm2 = vcmp.lt.s32.totalorder %v161_v22, 1  ;;  %vm181_vm3 = vcmp.lt.s32.totalorder %v161_v22, 2 }
  0x5c   : > { %v164_v41 = vshrl.u32 %v2186_v30, %v163_v29  ;;  %v166_v42 = vshrl.u32 %v2187_v32, %v163_v29  ;;  %v169_v43 = vshrl.u32 %v2188_v34, %v163_v29  ;;  %v172_v44 = vshrl.u32 %v2189_v36, %v163_v29 }
  0x5d   : > { %v175_v45 = vshrl.u32 %v2190_v38, %v163_v29  ;;  %v178_v47 = vshrl.u32 %v2191_v46, %v163_v29  ;;  %vm183_vm4 = vcmp.lt.s32.totalorder %v161_v22, 4  ;;  %v267_v51 = vsub.s32 32, %v266_v26 }
  0x5e   : > { %v167_v48 = vor.u32 %v166_v42, %v165_v31  ;;  %v170_v49 = vor.u32 %v169_v43, %v168_v33  ;;  %v173_v50 = vor.u32 %v172_v44, %v171_v35  ;;  %vm182_vm5 = vcmp.lt.s32.totalorder %v161_v22, 3 }
  0x5f   : > { %v176_v52 = vor.u32 %v175_v45, %v174_v37  ;;  %v179_v53 = vor.u32 %v178_v47, %v177_v39  ;;  %v269_v54 = vshll.u32 %v2186_v30, %v266_v26  ;;  %v272_v62 = vshll.u32 %v2187_v32, %v266_v26 }
  0x60   : > { %v184_v55 = vsel %vm180_vm2, %v164_v41, %v167_v48  ;;  %v185_v56 = vsel %vm183_vm4, %v173_v50, 2102212464  ;;  %v188_v57 = vsel %vm180_vm2, %v167_v48, %v170_v49  ;;  %v192_v58 = vsel %vm180_vm2, %v170_v49, %v173_v50 }
  0x61   : > { %v186_v59 = vsel %vm182_vm5, %v170_v49, %v185_v56  ;;  %v189_v60 = vsel %vm183_vm4, %v176_v52, 920167782  ;;  %v193_v61 = vsel %vm183_vm4, %v179_v53, 1326507024  ;;  %v268_v1 = vshrl.u32 %v2186_v30, %v267_v51 }
  0x62   : > { %v190_v63 = vsel %vm182_vm5, %v173_v50, %v189_v60  ;;  %v194_v0 = vsel %vm182_vm5, %v176_v52, %v193_v61  ;;  %v270_v2 = vshrl.u32 %v2187_v32, %v267_v51  ;;  %v187_v6 = vsel %vm181_vm3, %v184_v55, %v186_v59 }
  0x63   : > { %v191_v8 = vsel %vm181_vm3, %v188_v57, %v190_v63  ;;  %v195_v9 = vsel %vm181_vm3, %v192_v58, %v194_v0  ;;  %v273_v10 = vshrl.u32 %v2188_v34, %v267_v51  ;;  %v275_v17 = vshll.u32 %v2188_v34, %v266_v26 }
  0x64   : > { %v2381_v11 = vmul.u32.u64.low %v2348_v25, %v195_v9  ;;  %v2382_v12 = vmul.u32.u64.high %v2348_v25, %v195_v9, %v2381_v11  ;;  %v2385_v13 = vmul.u32.u64.low %v2348_v25, %v191_v8  ;;  %v2386_v14 = vmul.u32.u64.high %v2348_v25, %v191_v8, %v2385_v13 }
  0x65   : > { %v271_v15 = vor.u32 %v270_v2, %v269_v54  ;;  %v274_v16 = vor.u32 %v273_v10, %v272_v62  ;;  %v276_v18 = vshrl.u32 %v2189_v36, %v267_v51  ;;  %v278_v19 = vshll.u32 %v2189_v36, %v266_v26 }
  0x66   : > { %v279_v21 = vshrl.u32 %v2190_v38, %v267_v51  ;;  %v281_v22 = vshll.u32 %v2190_v38, %v266_v26  ;;  %v282_v23 = vshrl.u32 %v2191_v46, %v267_v51  ;;  %v203_v24 = vmul.u32 %v2348_v25, %v187_v6 }
  0x67   : > { %v277_v29 = vor.u32 %v276_v18, %v275_v17  ;;  %vm284_vm6 = vcmp.lt.s32.totalorder %v2361_v40, 1  ;;  %vm285_vm7 = vcmp.lt.s32.totalorder %v2361_v40, 2  ;;  %vm205_vm8 = vc.u32 %v2382_v12, %v2385_v13 }
  0x68   : > { %v206_v31 = vadd.s32 1, %v2386_v14  ;;  %v280_v33 = vor.u32 %v279_v21, %v278_v19  ;;  %vm286_vm9 = vcmp.lt.s32.totalorder %v2361_v40, 3  ;;  %v283_v35 = vor.u32 %v282_v23, %v281_v22  ;;  %v1871_v22 = vld [vmem:[%s2324_s14 + $0x18] sm:$0xff] }
  0x69   : > { %vm287_vm10 = vcmp.lt.s32.totalorder %v2361_v40, 4  ;;  %v288_v26 = vsel %vm284_vm6, %v268_v1, %v271_v15  ;;  %v292_v37 = vsel %vm284_vm6, %v271_v15, %v274_v16  ;;  %v296_v42 = vsel %vm284_vm6, %v274_v16, %v277_v29 }
  0x6a   : > { %v207_v25 = vsel %vm205_vm8, %v206_v31, %v2386_v14  ;;  %v289_v39 = vsel %vm287_vm10, %v277_v29, 2102212464  ;;  %v293_v41 = vsel %vm287_vm10, %v280_v33, 920167782  ;;  %v297_v47 = vsel %vm287_vm10, %v283_v35, 1326507024 }
  0x6b   : > { %v208_v43 = vadd.s32 %v207_v25, %v203_v24  ;;  %v290_v44 = vsel %vm286_vm9, %v274_v16, %v289_v39  ;;  %v294_v45 = vsel %vm286_vm9, %v277_v29, %v293_v41  ;;  %v298_v50 = vsel %vm286_vm9, %v280_v33, %v297_v47 }
  0x6c   : > { %v291_v48 = vsel %vm285_vm7, %v288_v26, %v290_v44  ;;  %v295_v49 = vsel %vm285_vm7, %v292_v37, %v294_v45  ;;  %v299_v52 = vsel %vm285_vm7, %v296_v42, %v298_v50  ;;  %v678_v57 = vand.u32 2139095040, %v2354_v28 }
  0x6d   : > { %v209_v51 = vadd.s32 536870912, %v208_v43  ;;  %v2411_v53 = vmul.u32.u64.low %v2350_v27, %v295_v49  ;;  %v2412_v54 = vmul.u32.u64.high %v2350_v27, %v295_v49, %v2411_v53  ;;  %v307_v59 = vmul.u32 %v2350_v27, %v291_v48 }
  0x6e   : > { %v2415_v55 = vmul.u32.u64.low %v2350_v27, %v299_v52  ;;  %v2416_v56 = vmul.u32.u64.high %v2350_v27, %v299_v52, %v2415_v55  ;;  %v679_v60 = vshrl.u32 %v678_v57, 23  ;;  %v675_v27 = vand.u32 2147483647, %v2354_v28 }
  0x6f   : > { %v2419_v58 = vshrl.u32 %v209_v51, 30  ;;  %v310_v40 = vadd.s32 1, %v2412_v54  ;;  %v204_v21 = vadd.s32 %v2385_v13, %v2382_v12  ;;  %v2442_v25 = vmul.f32 %v1871_v22, %v672_v20 }
  0x70   : > { %vm309_vm11 = vc.u32 %v2416_v56, %v2411_v53  ;;  %v1873_v62 = vadd.s32 4294967169, %v679_v60  ;;  %v682_v19 = vand.u32 8388607, %v675_v27  ;;  %v308_v26 = vadd.s32 %v2411_v53, %v2416_v56 }
  0x71   : > { %v211_v61 = vshll.u32 %v2419_v58, 30  ;;  %v311_v0 = vsel %vm309_vm11, %v310_v40, %v2412_v54  ;;  %vm2466_vm4 = vcmp.le.f32.partialorder %v148_v5, 0.7853982  ;;  %vm254_vm6 = vcmp.lt.s32.totalorder %v2334_v4, 0 }
  0x72   : > { %v312_v1 = vadd.s32 %v311_v0, %v307_v59  ;;  %v685_v2 = vadd.s32 1, %v1873_v62  ;;  %v683_v39 = vor.u32 8388608, %v682_v19  ;;  %vm2503_vm7 = vcmp.le.f32.partialorder %v252_v7, 0.7853982 }
  0x73   : > { %v212_v63 = vsub.s32 %v208_v43, %v211_v61 }
  0x74   : > { %v313_v8 = vadd.s32 536870912, %v312_v1  ;;  %vm686_vm12 = vcmp.gt.s32.totalorder %v685_v2, 0  ;;  %v723_v22 = vshll.u32 %v683_v39, 8 }
  0x75   : > { %v214_v6 = vsub.s32 0, %v212_v63  ;;  %v687_v11 = vsel %vm686_vm12, %v685_v2, 0  ;;  %vm240_vm12 = vweird.f32 %v2332_v3 }
  0x76   : > { %v2426_v10 = vshrl.u32 %v313_v8, 30  ;;  %v689_v16 = vand.u32 31, %v687_v11  ;;  %v688_v44 = vshrl.u32 %v687_v11, 5 }
  0x77   : > { %v1834_v9 = vmin.u32 %v214_v6, %v212_v63 }
  0x78   : > { %v315_v15 = vshll.u32 %v2426_v10, 30  ;;  %v690_v23 = vsub.s32 32, %v689_v16  ;;  %v692_v12 = vshll.u32 %v2186_v30, %v689_v16  ;;  %v695_v45 = vshll.u32 %v2187_v32, %v689_v16 }
  0x79   : > { %v216_v14 = vclz %v1834_v9  ;;  %v698_v47 = vshll.u32 %v2188_v34, %v689_v16  ;;  %v701_v53 = vshll.u32 %v2189_v36, %v689_v16  ;;  %v704_v59 = vshll.u32 %v2190_v38, %v689_v16 }
  0x7a   : > { %v2430_v18 = vsub.s32 %v312_v1, %v315_v15  ;;  %v693_v13 = vshrl.u32 %v2187_v32, %v690_v23  ;;  %v691_v20 = vshrl.u32 %v2186_v30, %v690_v23  ;;  %v696_v50 = vshrl.u32 %v2188_v34, %v690_v23 }
  0x7b   : > { %v1835_v17 = vadd.s32 4294967294, %v216_v14  ;;  %v699_v52 = vshrl.u32 %v2189_v36, %v690_v23  ;;  %v702_v54 = vshrl.u32 %v2190_v38, %v690_v23  ;;  %v705_v40 = vshrl.u32 %v2191_v46, %v690_v23 }
  0x7c   : > { %v318_v29 = vsub.s32 0, %v2430_v18  ;;  %v694_v57 = vor.u32 %v693_v13, %v692_v12  ;;  %v697_v60 = vor.u32 %v696_v50, %v695_v45  ;;  %vm707_vm0 = vcmp.lt.s32.totalorder %v688_v44, 1 }
  0x7d   : > { %vm1836_vm13 = vcmp.lt.s32.totalorder %v1835_v17, 0  ;;  %v700_v61 = vor.u32 %v699_v52, %v698_v47  ;;  %v703_v0 = vor.u32 %v702_v54, %v701_v53  ;;  %vm708_vm1 = vcmp.lt.s32.totalorder %v688_v44, 2 }
  0x7e   : > { %v219_v24 = vsel %vm1836_vm13, 0, %v1835_v17  ;;  %v1838_v37 = vmin.u32 %v318_v29, %v2430_v18  ;;  %v706_v9 = vor.u32 %v705_v40, %v704_v59  ;;  %vm709_vm2 = vcmp.lt.s32.totalorder %v688_v44, 3 }
  0x7f   : > { %v220_v31 = vsub.s32 32, %v219_v24  ;;  %v221_v33 = vshll.u32 %v212_v63, %v219_v24  ;;  %v224_v35 = vsub.s32 4294967266, %v219_v24  ;;  %vm710_vm3 = vcmp.lt.s32.totalorder %v688_v44, 4 }
  0x80   : > { %v320_v43 = vclz %v1838_v37  ;;  %v712_v15 = vsel %vm710_vm3, %v700_v61, 2102212464  ;;  %v715_v16 = vsel %vm707_vm0, %v694_v57, %v697_v60  ;;  %v711_v19 = vsel %vm707_vm0, %v691_v20, %v694_v57 }
  0x81   : > { %v222_v41 = vshrl.u32 %v204_v21, %v220_v31  ;;  %v225_v42 = vadd.s32 127, %v224_v35  ;;  %v716_v21 = vsel %vm710_vm3, %v703_v0, 920167782  ;;  %v713_v24 = vsel %vm709_vm2, %v697_v60, %v712_v15 }
  0x82   : > { %v1839_v51 = vadd.s32 4294967294, %v320_v43  ;;  %v719_v29 = vsel %vm707_vm0, %v697_v60, %v700_v61  ;;  %v720_v35 = vsel %vm710_vm3, %v706_v9, 1326507024  ;;  %v714_v12 = vsel %vm708_vm1, %v711_v19, %v713_v24 }
  0x83   : > { %v223_v48 = vor.u32 %v222_v41, %v221_v33  ;;  %v226_v49 = vshll.u32 %v225_v42, 23  ;;  %v721_v42 = vsel %vm709_vm2, %v703_v0, %v720_v35  ;;  %v234_v44 = vsub.s32 4, %v2419_v58 }
  0x84   : > { %vm1840_vm15 = vcmp.lt.s32.totalorder %v1839_v51, 0  ;;  %v722_v13 = vsel %vm708_vm1, %v719_v29, %v721_v42  ;;  %v565_v24 = vstv %s2498_s28  ;;  %v583_v35 = vstv %s2513_s12  ;;  %s2998_s28 = sld [smem:[#allocation3 + $0x16]]  ;;  %s3039_s12 = sld [smem:[#allocation3 + $0x1c]] }
  0x85   : > { %v227_v55 = vor.u32 4788187, %v226_v49  ;;  %v230_v56 = vcvt.s32.f32 %v223_v48  ;;  %v323_v63 = vsel %vm1840_vm15, 0, %v1839_v51  ;;  %v730_v51 = vmul.u32 %v723_v22, %v714_v12 }
  0x86   : > { %v324_v1 = vsub.s32 32, %v323_v63  ;;  %v325_v2 = vshll.u32 %v2430_v18, %v323_v63  ;;  %v328_v6 = vsub.s32 4294967266, %v323_v63  ;;  %v717_v18 = vsel %vm709_vm2, %v700_v61, %v716_v21 }
  0x87   : > { %v228_v62 = vand.u32 2147483647, %v227_v55  ;;  %v718_v33 = vsel %vm708_vm1, %v715_v16, %v717_v18  ;;  %v2479_v47 = vmul.u32.u64.low %v723_v22, %v722_v13  ;;  %v2480_v48 = vmul.u32.u64.high %v723_v22, %v722_v13, %v2479_v47 }
  0x88   : > { %v326_v11 = vshrl.u32 %v308_v26, %v324_v1  ;;  %v329_v14 = vadd.s32 127, %v328_v6  ;;  %v782_v26 = vand.u32 2139095040, %v2442_v25  ;;  %v235_v59 = vsel %vm150_vm14, %v234_v44, %v2419_v58 }
  0x89   : > { %v231_v8 = vmul.f32 %v230_v56, %v228_v62  ;;  %v2475_v43 = vmul.u32.u64.low %v723_v22, %v718_v33  ;;  %v2476_v45 = vmul.u32.u64.high %v723_v22, %v718_v33, %v2475_v43  ;;  %v237_v62 = vsel %vm2466_vm4, 0, %v235_v59 }
  0x8a   : > { %v330_v23 = vshll.u32 %v329_v14, 23  ;;  %v327_v31 = vor.u32 %v326_v11, %v325_v2  ;;  %v783_v50 = vshrl.u32 %v782_v26, 23  ;;  %v449_v7 = vand.u32 3, %v237_v62 }
  0x8b   : > { %v232_v17 = vxor.u32 2147483648, %v231_v8  ;;  %v733_v52 = vadd.s32 1, %v2476_v45  ;;  %vm732_vm5 = vc.u32 %v2480_v48, %v2475_v43  ;;  %v338_v16 = vsub.s32 4, %v2426_v10 }
  0x8c   : > { %v331_v41 = vor.u32 4788187, %v330_v23  ;;  %v334_v20 = vcvt.s32.f32 %v327_v31  ;;  %v1877_v55 = vadd.s32 4294967169, %v783_v50  ;;  %vm451_vm9 = vcmp.eq.s32.totalorder %v449_v7, 0 }
  0x8d   : > { %v233_v39 = vsel %vm150_vm14, %v232_v17, %v231_v8  ;;  %v734_v54 = vsel %vm732_vm5, %v733_v52, %v2476_v45  ;;  %vm454_vm10 = vcmp.eq.s32.totalorder %v449_v7, 2  ;;  %v779_v22 = vand.u32 2147483647, %v2442_v25 }
  0x8e   : > { %v236_v5 = vsel %vm2466_vm4, %v2332_v3, %v233_v39  ;;  %v332_v49 = vand.u32 2147483647, %v331_v41  ;;  %v735_v56 = vadd.s32 %v734_v54, %v730_v51  ;;  %v789_v61 = vadd.s32 1, %v1877_v55  ;;  %v1912_v3 = vld [vmem:[%s2324_s14 + $0x28] sm:$0xff] }
  0x8f   : > { %2043 = vcosq.f32 %v236_v5  ;;  %v241_v23 = vadd.s32 3, %v237_v62  ;;  %v571_v18 = vstv %s2509_s11  ;;  %v339_v29 = vsel %vm254_vm6, %v338_v16, %v2426_v10  ;;  %s3008_s11 = sld [smem:[#allocation3 + $0x19]] }
  0x90   : > { %2045 = vsinq.f32 %v236_v5  ;;  %v335_v53 = vmul.f32 %v334_v20, %v332_v49  ;;  %v736_v57 = vadd.s32 536870912, %v735_v56  ;;  %vm790_vm8 = vcmp.gt.s32.totalorder %v789_v61, 0 }
  0x91   : > { %v791_v11 = vsel %vm790_vm8, %v789_v61, 0  ;;  %vm450_vm11 = vcmp.lt.s32.totalorder %v449_v7, 2  ;;  %v589_v26 = vstv %s2515_s15  ;;  %v601_v10 = vstv %s2521_s16  ;;  %s3072_s15 = sld [smem:[#allocation3 + $0x1f]]  ;;  %s3074_s16 = sld [smem:[#allocation3 + $0x22]] }
  0x92   : > { %v336_v60 = vxor.u32 2147483648, %v335_v53  ;;  %v2494_v40 = vshrl.u32 %v736_v57, 30  ;;  %v2543_v19 = vand.u32 31, %v791_v11  ;;  %v607_v39 = vstv %s2523_s17  ;;  %s3084_s17 = sld [smem:[#allocation3 + $0x2]] }
  0x93   : > { %v2565_v42 = vand.u32 8388607, %v779_v22  ;;  %v2567_v12 = vand.u32 3, %v241_v23  ;;  %v341_v13 = vsel %vm2503_vm7, 0, %v339_v29  ;;  %v619_v47 = vstv %s2528_s18  ;;  %s3090_s18 = sld [smem:[#allocation3 + $0x5]] }
  0x94   : > { %v738_v63 = vshll.u32 %v2494_v40, 30  ;;  %v337_v58 = vsel %vm254_vm6, %v336_v60, %v335_v53  ;;  %v794_v37 = vsub.s32 32, %v2543_v19  ;;  %v625_v5 = vstv %s2530_s23  ;;  %s3094_s23 = sld [smem:[#allocation3 + $0x8]] }
  0x95   : > { %v340_v8 = vsel %vm2503_vm7, %v2334_v4, %v337_v58  ;;  %v637_v49 = vstv %s2533_s25  ;;  %v643_v20 = vstv %s2535_s26  ;;  %v655_v50 = vstv %s2540_s3  ;;  %s3131_s25 = sld [smem:[#allocation3 + $0xb]]  ;;  %s3182_s26 = sld [smem:[#allocation3 + $0xe]] }
  0x96   : > { %v2517_v2 = vsub.s32 %v735_v56, %v738_v63  ;;  %2047 = vcosq.f32 %v340_v8  ;;  %v345_v51 = vadd.s32 3, %v341_v13  ;;  %v805_v52 = vshll.u32 %v2189_v36, %v2543_v19  ;;  %s3203_s3 = sld [smem:[#allocation3 + $0x11]] }
  0x97   : > { %2049 = vsinq.f32 %v340_v8  ;;  %v806_v44 = vshrl.u32 %v2190_v38, %v794_v37  ;;  %v552_v54 = vand.u32 3, %v341_v13  ;;  %v787_v55 = vor.u32 8388608, %v2565_v42 }
  0x98   : > { %v741_v9 = vsub.s32 0, %v2517_v2  ;;  %v2582_v56 = vshrl.u32 %v791_v11, 5  ;;  %vm243_vm14 = vcmp.lt.s32.totalorder %v2567_v12, 2  ;;  %vm244_vm15 = vcmp.eq.s32.totalorder %v2567_v12, 0 }
  0x99   : > { %v2511_v1 = vpop.eup %2043  ;;  %v796_v59 = vshll.u32 %v2186_v30, %v2543_v19  ;;  %v797_v60 = vshrl.u32 %v2187_v32, %v794_v37  ;;  %v799_v61 = vshll.u32 %v2187_v32, %v2543_v19  ;;  %v800_v0 = vshrl.u32 %v2188_v34, %v794_v37 }
  0x9a   : > { %v2519_v6 = vpop.eup %2045  ;;  %v248_v15 = vxor.u32 2147483648, %v2511_v1  ;;  %v1874_v17 = vmin.u32 %v741_v9, %v2517_v2  ;;  %v802_v58 = vshll.u32 %v2188_v34, %v2543_v19  ;;  %v803_v7 = vshrl.u32 %v2189_v36, %v794_v37 }
  0x9b   : > { %v245_v14 = vxor.u32 2147483648, %v2519_v6  ;;  %vm247_vm0 = vcmp.eq.s32.totalorder %v2567_v12, 2  ;;  %v2604_v8 = vand.u32 3, %v345_v51  ;;  %v807_v11 = vor.u32 %v806_v44, %v805_v52 }
  0x9c   : > { %v743_v21 = vclz %v1874_v17  ;;  %v456_v33 = vsel %vm454_vm10, %v248_v15, %v2519_v6  ;;  %vm553_vm1 = vcmp.lt.s32.totalorder %v552_v54, 2  ;;  %vm554_vm2 = vcmp.eq.s32.totalorder %v552_v54, 0 }
  0x9d   : > { %v453_v31 = vsel %vm451_vm9, %v2511_v1, %v245_v14  ;;  %vm557_vm3 = vcmp.eq.s32.totalorder %v552_v54, 2  ;;  %vm814_vm4 = vcmp.lt.s32.totalorder %v2582_v56, 4  ;;  %vm344_vm5 = vweird.f32 %v2334_v4 }
  0x9e   : > { %v1875_v41 = vadd.s32 4294967294, %v743_v21  ;;  %v457_v45 = vsel %vm450_vm11, %v453_v31, %v456_v33  ;;  %v798_v23 = vor.u32 %v797_v60, %v796_v59  ;;  %v801_v29 = vor.u32 %v800_v0, %v799_v61 }
  0x9f   : > { %v458_v53 = vsel %vm240_vm12, nan, %v457_v45  ;;  %v804_v31 = vor.u32 %v803_v7, %v802_v58  ;;  %v808_v33 = vshll.u32 %v2190_v38, %v2543_v19  ;;  %vm811_vm6 = vcmp.lt.s32.totalorder %v2582_v56, 1 }
  0xa0   : > { %vm1876_vm13 = vcmp.lt.s32.totalorder %v1875_v41, 0  ;;  %v2584_v57 = vpop.eup %2047  ;;  %v2606_v9 = vmul.f32 2.0, %v458_v53  ;;  %vm813_vm7 = vcmp.lt.s32.totalorder %v2582_v56, 3  ;;  %v820_v13 = vsel %vm814_vm4, %v807_v11, 920167782 }
  0xa1   : > { %v2593_v62 = vpop.eup %2049  ;;  %v2597_v63 = vsel %vm1876_vm13, 0, %v1875_v41  ;;  %v352_v17 = vxor.u32 2147483648, %v2584_v57  ;;  %v809_v41 = vshrl.u32 %v2191_v46, %v794_v37  ;;  %v246_v19 = vsel %vm244_vm15, %v2511_v1, %v245_v14 }
  0xa2   : > { %v349_v16 = vxor.u32 2147483648, %v2593_v62  ;;  %v751_v21 = vsub.s32 4294967266, %v2597_v63  ;;  %v578_v42 = vmul.f32 %v2606_v9, %v2606_v9  ;;  %v249_v45 = vsel %vm247_vm0, %v248_v15, %v2519_v6 }
  0xa3   : > { %v731_v51 = vadd.s32 %v2475_v43, %v2480_v48  ;;  %v795_v52 = vshrl.u32 %v2186_v30, %v794_v37  ;;  %v559_v53 = vsel %vm557_vm3, %v352_v17, %v2593_v62  ;;  %v747_v59 = vsub.s32 32, %v2597_v63 }
  0xa4   : > { %v556_v44 = vsel %vm554_vm2, %v2584_v57, %v349_v16  ;;  %v752_v14 = vadd.s32 127, %v751_v21  ;;  %v810_v60 = vor.u32 %v809_v41, %v808_v33  ;;  %vm812_vm8 = vcmp.lt.s32.totalorder %v2582_v56, 2 }
  0xa5   : > { %v819_v1 = vsel %vm811_vm6, %v798_v23, %v801_v29  ;;  %v821_v43 = vsel %vm813_vm7, %v804_v31, %v820_v13  ;;  %v2647_v48 = vadd.f32 -2.0, %v578_v42  ;;  %v661_v6 = vstv %s2595_s4  ;;  %s3210_s4 = sld [smem:[#allocation3 + $0x14]] }
  0xa6   : > { %v816_v15 = vsel %vm814_vm4, %v804_v31, 2102212464  ;;  %v1199_v37 = vstv %s2608_s5  ;;  %v250_v61 = vsel %vm243_vm14, %v246_v19, %v249_v45  ;;  %vm347_vm9 = vcmp.lt.s32.totalorder %v2604_v8, 2  ;;  %v1911_v19 = vld [vmem:[%s2324_s14 + $0x20] sm:$0xff]  ;;  %s2712_s14 = sld [smem:[#allocation3 + $0x10]]  ;;  %s2724_s5 = sld [smem:[#allocation3 + $0x13]] }
  0xa7   : > { %v560_v0 = vsel %vm553_vm1, %v556_v44, %v559_v53  ;;  %v827_v58 = vshll.u32 %v787_v55, 8  ;;  %v748_v7 = vshll.u32 %v2517_v2, %v2597_v63  ;;  %v749_v21 = vshrl.u32 %v731_v51, %v747_v59 }
  0xa8   : > { %v753_v33 = vshll.u32 %v752_v14, 23  ;;  %v822_v41 = vsel %vm812_vm8, %v819_v1, %v821_v43  ;;  %v815_v12 = vsel %vm811_vm6, %v795_v52, %v798_v23  ;;  %v817_v54 = vsel %vm813_vm7, %v801_v29, %v816_v15 }
  0xa9   : > { %v823_v55 = vsel %vm811_vm6, %v801_v29, %v804_v31  ;;  %v824_v42 = vsel %vm814_vm4, %v810_v60, 1326507024  ;;  %v251_v2 = vsel %vm240_vm12, nan, %v250_v61  ;;  %vm348_vm10 = vcmp.eq.s32.totalorder %v2604_v8, 0 }
  0xaa   : > { %vm351_vm11 = vcmp.eq.s32.totalorder %v2604_v8, 2  ;;  %v596_v63 = vmul.f32 %v2647_v48, %v2647_v48  ;;  %v561_v23 = vsel %vm344_vm5, nan, %v560_v0  ;;  %v825_v29 = vsel %vm813_vm7, %v807_v11, %v824_v42 }
  0xab   : > { %v2685_v31 = vmul.u32.u64.low %v827_v58, %v822_v41  ;;  %v2686_v13 = vmul.u32.u64.high %v827_v58, %v822_v41, %v2685_v31  ;;  %v750_v45 = vor.u32 %v749_v21, %v748_v7  ;;  %v754_v51 = vor.u32 4788187, %v753_v33 }
  0xac   : > { %v818_v52 = vsel %vm812_vm8, %v815_v12, %v817_v54  ;;  %v826_v44 = vsel %vm812_vm8, %v823_v55, %v825_v29  ;;  %v350_v11 = vsel %vm348_vm10, %v2584_v57, %v349_v16  ;;  %v353_v53 = vsel %vm351_vm11, %v352_v17, %v2593_v62 }
  0xad   : > { %v2701_v59 = vmul.u32.u64.low %v827_v58, %v826_v44  ;;  %v2702_v14 = vmul.u32.u64.high %v827_v58, %v826_v44, %v2701_v59  ;;  %v2704_v60 = vmul.f32 2.0, %v561_v23  ;;  %v576_v1 = vmul.f32 %v2606_v9, %v251_v2 }
  0xae   : > { %vm677_vm12 = vcmp.lt.s32.totalorder %v2354_v28, 0  ;;  %v2708_v56 = vmul.f32 %v1911_v19, %v1199_v37  ;;  %v834_v43 = vmul.u32 %v827_v58, %v818_v52  ;;  %v837_v15 = vadd.s32 1, %v2686_v13 }
  0xaf   : > { %v1092_v57 = vstv %s2657_s6  ;;  %v2714_v62 = vmul.f32 %v1912_v3, %v1199_v37  ;;  %v354_v16 = vsel %vm347_vm9, %v350_v11, %v353_v53  ;;  %v1854_v17 = vadd.f32 -2.0, %v596_v63  ;;  %s3218_s6 = sld [smem:[#allocation3 + $0x17]] }
  0xb0   : > { %vm2720_vm13 = vcmp.le.f32.partialorder %v675_v27, 0.7853982  ;;  %v755_v0 = vand.u32 2147483647, %v754_v51  ;;  %v757_v58 = vcvt.s32.f32 %v750_v45  ;;  %v761_v7 = vsub.s32 4, %v2494_v40 }
  0xb1   : > { %vm836_vm14 = vc.u32 %v2702_v14, %v2685_v31  ;;  %v1098_v8 = vstv %s2671_s10  ;;  %v1110_v37 = vstv %s2673_s13  ;;  %v566_v27 = vmul.f32 %v565_v24, %v251_v2  ;;  %s3225_s10 = sld [smem:[#allocation3 + $0x1a]]  ;;  %s3227_s13 = sld [smem:[#allocation3 + $0x1d]] }
  0xb2   : > { %v579_v21 = vmul.f32 %v2704_v60, %v2704_v60  ;;  %v584_v33 = vmul.f32 %v583_v35, %v576_v1  ;;  %v838_v41 = vsel %vm836_vm14, %v837_v15, %v2686_v13  ;;  %v355_v12 = vsel %vm344_vm5, nan, %v354_v16 }
  0xb3   : > { %v594_v54 = vmul.f32 %v2647_v48, %v576_v1  ;;  %v839_v55 = vadd.s32 %v838_v41, %v834_v43  ;;  %v1205_v42 = vand.u32 2139095040, %v2708_v56  ;;  %v614_v63 = vmul.f32 %v1854_v17, %v1854_v17 }
  0xb4   : > { %v758_v23 = vmul.f32 %v757_v58, %v755_v0  ;;  %v1116_v29 = vstv %s2695_s8  ;;  %v1128_v2 = vstv %s2697_s9  ;;  %v572_v19 = vmul.f32 %v571_v18, %v2606_v9  ;;  %s3242_s8 = sld [smem:[#allocation3 + $0x20]]  ;;  %s3246_s9 = sld [smem:[#allocation3 + $0x23]] }
  0xb5   : > { %v590_v13 = vmul.f32 %v2647_v48, %v589_v26  ;;  %v840_v4 = vadd.s32 536870912, %v839_v55  ;;  %v1206_v3 = vshrl.u32 %v1205_v42, 23  ;;  %v577_v45 = vmul.f32 %v2704_v60, %v355_v12 }
  0xb6   : > { %v1851_v51 = vadd.f32 -2.0, %v579_v21  ;;  %v586_v52 = vadd.f32 %v584_v33, %v566_v27  ;;  %v762_v44 = vsel %vm677_vm12, %v761_v7, %v2494_v40  ;;  %v602_v11 = vmul.f32 %v601_v10, %v594_v54 }
  0xb7   : > { %v612_v53 = vmul.f32 %v1854_v17, %v594_v54  ;;  %v2756_v9 = vshrl.u32 %v840_v4, 30  ;;  %v1914_v48 = vadd.s32 4294967169, %v1206_v3  ;;  %v1858_v59 = vadd.f32 -2.0, %v614_v63 }
  0xb8   : > { %v759_v1 = vxor.u32 2147483648, %v758_v23  ;;  %v1134_v43 = vstv %s2712_s14  ;;  %v1146_v15 = vstv %s2724_s5  ;;  %v592_v16 = vadd.f32 %v590_v13, %v572_v19  ;;  %s1831_s14 = sshll.u32 %s2320_s7, 4 }
  0xb9   : > { %v2762_v0 = vsel %vm2720_vm13, 0, %v762_v44  ;;  %v842_v40 = vshll.u32 %v2756_v9, 30  ;;  %v1212_v58 = vadd.s32 1, %v1914_v48  ;;  %v567_v7 = vmul.f32 %v565_v24, %v355_v12  ;;  %s139_s5 = scalar_lea.vmem [#allocation7], %s1831_s14 }
  0xba   : > { %v585_v27 = vmul.f32 %v583_v35, %v577_v45  ;;  %v597_v21 = vmul.f32 %v1851_v51, %v1851_v51  ;;  %v608_v33 = vmul.f32 %v1854_v17, %v607_v39  ;;  %v595_v41 = vmul.f32 %v1851_v51, %v577_v45 }
  0xbb   : > { %v604_v54 = vadd.f32 %v602_v11, %v586_v52  ;;  %v620_v42 = vmul.f32 %v619_v47, %v612_v53  ;;  %v2773_v63 = vsub.s32 %v839_v55, %v842_v40  ;;  %v630_v19 = vmul.f32 %v1858_v59, %v612_v53 }
  0xbc   : > { %v632_v13 = vmul.f32 %v1858_v59, %v1858_v59  ;;  %v760_v4 = vsel %vm677_vm12, %v759_v1, %v758_v23  ;;  %v768_v24 = vadd.s32 3, %v2762_v0  ;;  %v573_v35 = vmul.f32 %v571_v18, %v2704_v60 }
  0xbd   : > { %v591_v17 = vmul.f32 %v1851_v51, %v589_v26  ;;  %v845_v12 = vsub.s32 0, %v2773_v63  ;;  %vm1213_vm15 = vcmp.gt.s32.totalorder %v1212_v58, 0  ;;  %v587_v3 = vadd.f32 %v585_v27, %v567_v7 }
  0xbe   : > { %v1855_v55 = vadd.f32 -2.0, %v597_v21  ;;  %v610_v45 = vadd.f32 %v608_v33, %v592_v16  ;;  %v626_v52 = vmul.f32 %v1858_v59, %v625_v5  ;;  %v603_v23 = vmul.f32 %v601_v10, %v595_v41 }
  0xbf   : > { %v622_v44 = vadd.f32 %v620_v42, %v604_v54  ;;  %v763_v11 = vsel %vm2720_vm13, %v2354_v28, %v760_v4  ;;  %v1878_v18 = vmin.u32 %v845_v12, %v2773_v63  ;;  %v1862_v60 = vadd.f32 -2.0, %v632_v13 }
  0xc0   : > { %v613_v26 = vmul.f32 %v1855_v55, %v595_v41  ;;  %v638_v51 = vmul.f32 %v637_v49, %v630_v19  ;;  %v1214_v53 = vsel %vm1213_vm15, %v1212_v58, 0  ;;  %v593_v48 = vadd.f32 %v591_v17, %v573_v35 }
  0xc1   : > { %v609_v1 = vmul.f32 %v1855_v55, %v607_v39  ;;  %v2796_v16 = vand.u32 3, %v768_v24  ;;  %v847_v59 = vclz %v1878_v18  ;;  %v615_v10 = vmul.f32 %v1855_v55, %v1855_v55 }
  0xc2   : > { %v628_v40 = vadd.f32 %v626_v52, %v610_v45  ;;  %v644_v7 = vmul.f32 %v1862_v60, %v643_v20  ;;  %2051 = vcosq.f32 %v763_v11  ;;  %v605_v61 = vadd.f32 %v603_v23, %v587_v3 }
  0xc3   : > { %2053 = vsinq.f32 %v763_v11  ;;  %v1879_v27 = vadd.s32 4294967294, %v847_v59  ;;  %v1216_v21 = vand.u32 31, %v1214_v53  ;;  %v621_v33 = vmul.f32 %v619_v47, %v613_v26 }
  0xc4   : > { %v2802_v41 = vadd.f32 %v638_v51, %v622_v44  ;;  %v648_v58 = vmul.f32 %v1862_v60, %v630_v19  ;;  %v650_v54 = vmul.f32 %v1862_v60, %v1862_v60  ;;  %v2804_v39 = vadd.f32 %v609_v1, %v593_v48 }
  0xc5   : > { %v835_v42 = vadd.s32 %v2685_v31, %v2702_v14  ;;  %vm1880_vm0 = vcmp.lt.s32.totalorder %v1879_v27, 0  ;;  %v1202_v13 = vand.u32 2147483647, %v2708_v56  ;;  %v1859_v4 = vadd.f32 -2.0, %v615_v10 }
  0xc6   : > { %v2809_v24 = vadd.f32 %v644_v7, %v628_v40  ;;  %v850_v35 = vsel %vm1880_vm0, 0, %v1879_v27  ;;  %v1309_v47 = vand.u32 2139095040, %v2714_v62  ;;  %v1217_v3 = vsub.s32 32, %v1216_v21 }
  0xc7   : > { %v851_v17 = vsub.s32 32, %v850_v35  ;;  %v852_v12 = vshll.u32 %v2773_v63, %v850_v35  ;;  %v855_v19 = vsub.s32 4294967266, %v850_v35  ;;  %v2813_v55 = vadd.f32 %v621_v33, %v605_v61 }
  0xc8   : > { %v2817_v45 = vmul.f32 %v1859_v4, %v625_v5  ;;  %v1866_v31 = vadd.f32 -2.0, %v650_v54  ;;  %v656_v14 = vmul.f32 %v655_v50, %v648_v58  ;;  %v2822_v44 = vand.u32 3, %v2762_v0 }
  0xc9   : > { %v853_v52 = vshrl.u32 %v835_v42, %v851_v17  ;;  %v856_v23 = vadd.s32 127, %v855_v19  ;;  %v1209_v11 = vand.u32 8388607, %v1202_v13  ;;  %v2826_v18 = vshrl.u32 %v1214_v53, 5 }
  0xca   : > { %v1219_v63 = vshll.u32 %v2186_v30, %v1216_v21  ;;  %v1222_v60 = vshll.u32 %v2187_v32, %v1216_v21  ;;  %v1310_v51 = vshrl.u32 %v1309_v47, 23  ;;  %vm781_vm1 = vcmp.lt.s32.totalorder %v2442_v25, 0 }
  0xcb   : > { %v854_v5 = vor.u32 %v853_v52, %v852_v12  ;;  %v857_v48 = vshll.u32 %v856_v23, 23  ;;  %v1228_v1 = vshll.u32 %v2189_v36, %v1216_v21  ;;  %v1229_v59 = vshrl.u32 %v2190_v38, %v1217_v3 }
  0xcc   : > { %v2833_v0 = vpop.eup %2051  ;;  %v1220_v10 = vshrl.u32 %v2187_v32, %v1217_v3  ;;  %v1223_v53 = vshrl.u32 %v2188_v34, %v1217_v3  ;;  %v1225_v40 = vshll.u32 %v2188_v34, %v1216_v21  ;;  %v1226_v7 = vshrl.u32 %v2189_v36, %v1217_v3 }
  0xcd   : > { %v2839_v61 = vpop.eup %2053  ;;  %v858_v27 = vor.u32 4788187, %v857_v48  ;;  %v861_v33 = vcvt.s32.f32 %v854_v5  ;;  %v1231_v58 = vshll.u32 %v2190_v38, %v1216_v21  ;;  %v1232_v54 = vshrl.u32 %v2191_v46, %v1217_v3 }
  0xce   : > { %v2843_v42 = vmul.f32 %v1859_v4, %v613_v26  ;;  %v633_v35 = vmul.f32 %v1859_v4, %v1859_v4  ;;  %vm2847_vm2 = vcmp.le.f32.partialorder %v779_v22, 0.7853982  ;;  %vm981_vm3 = vcmp.eq.s32.totalorder %v2822_v44, 2 }
  0xcf   : > { %v1918_v17 = vadd.s32 4294967169, %v1310_v51  ;;  %v775_v12 = vxor.u32 2147483648, %v2833_v0  ;;  %v859_v19 = vand.u32 2147483647, %v858_v27  ;;  %v1210_v52 = vor.u32 8388608, %v1209_v11 }
  0xd0   : > { %v1230_v23 = vor.u32 %v1229_v59, %v1228_v1  ;;  %vm767_vm4 = vweird.f32 %v2354_v28  ;;  %v772_v26 = vxor.u32 2147483648, %v2839_v61  ;;  %v1221_v21 = vor.u32 %v1220_v10, %v1219_v63 }
  0xd1   : > { %v1224_v4 = vor.u32 %v1223_v53, %v1222_v60  ;;  %vm1237_vm5 = vcmp.lt.s32.totalorder %v2826_v18, 4  ;;  %v862_v22 = vmul.f32 %v861_v33, %v859_v19  ;;  %v1227_v5 = vor.u32 %v1226_v7, %v1225_v40 }
  0xd2   : > { %v1233_v48 = vor.u32 %v1232_v54, %v1231_v58  ;;  %vm1234_vm6 = vcmp.lt.s32.totalorder %v2826_v18, 1  ;;  %vm977_vm7 = vcmp.lt.s32.totalorder %v2822_v44, 2  ;;  %vm978_vm8 = vcmp.eq.s32.totalorder %v2822_v44, 0 }
  0xd3   : > { %vm1236_vm9 = vcmp.lt.s32.totalorder %v2826_v18, 3  ;;  %v1316_v11 = vadd.s32 1, %v1918_v17  ;;  %v863_v51 = vxor.u32 2147483648, %v862_v22  ;;  %v1218_v1 = vshrl.u32 %v2186_v30, %v1217_v3 }
  0xd4   : > { %v1243_v63 = vsel %vm1237_vm5, %v1230_v23, 920167782  ;;  %v1250_v60 = vshll.u32 %v1210_v52, 8  ;;  %v983_v59 = vsel %vm981_vm3, %v775_v12, %v2839_v61  ;;  %vm1235_vm10 = vcmp.lt.s32.totalorder %v2826_v18, 2 }
  0xd5   : > { %v1239_v10 = vsel %vm1237_vm5, %v1227_v5, 2102212464  ;;  %v1242_v53 = vsel %vm1234_vm6, %v1221_v21, %v1224_v4  ;;  %v980_v3 = vsel %vm978_vm8, %v2833_v0, %v772_v26  ;;  %v1244_v40 = vsel %vm1236_vm9, %v1227_v5, %v1243_v63 }
  0xd6   : > { %v1246_v7 = vsel %vm1234_vm6, %v1224_v4, %v1227_v5  ;;  %v1247_v27 = vsel %vm1237_vm5, %v1233_v48, 1326507024  ;;  %v2883_v33 = vadd.f32 %v656_v14, %v2802_v41  ;;  %v662_v58 = vmul.f32 %v1866_v31, %v661_v6 }
  0xd7   : > { %v864_v54 = vsel %vm781_vm1, %v863_v51, %v862_v22  ;;  %vm1317_vm11 = vcmp.gt.s32.totalorder %v1316_v11, 0  ;;  %v1238_v17 = vsel %vm1234_vm6, %v1218_v1, %v1221_v21  ;;  %v1240_v19 = vsel %vm1236_vm9, %v1224_v4, %v1239_v10 }
  0xd8   : > { %v1245_v52 = vsel %vm1235_vm10, %v1242_v53, %v1244_v40  ;;  %v1248_v5 = vsel %vm1236_vm9, %v1230_v23, %v1247_v27  ;;  %v639_v41 = vmul.f32 %v637_v49, %v2843_v42  ;;  %v984_v31 = vsel %vm977_vm7, %v980_v3, %v983_v59 }
  0xd9   : > { %v1249_v14 = vsel %vm1235_vm10, %v1246_v7, %v1248_v5  ;;  %v1306_v21 = vand.u32 2147483647, %v2714_v62  ;;  %v867_v4 = vsel %vm2847_vm2, %v2442_v25, %v864_v54  ;;  %v1318_v51 = vsel %vm1317_vm11, %v1316_v11, 0 }
  0xda   : > { %v2908_v22 = vmul.u32.u64.low %v1250_v60, %v1249_v14  ;;  %v2909_v48 = vmul.u32.u64.high %v1250_v60, %v1249_v14, %v2908_v22  ;;  %v2913_v23 = vadd.f32 %v2817_v45, %v2804_v39  ;;  %v1241_v49 = vsel %vm1235_vm10, %v1238_v17, %v1240_v19 }
  0xdb   : > { %v2917_v44 = vmul.u32.u64.low %v1250_v60, %v1245_v52  ;;  %v2918_v1 = vmul.u32.u64.high %v1250_v60, %v1245_v52, %v2917_v44  ;;  %v1863_v63 = vadd.f32 -2.0, %v633_v35  ;;  %v2922_v59 = vadd.f32 %v662_v58, %v2809_v24 }
  0xdc   : > { %v985_v10 = vsel %vm767_vm4, nan, %v984_v31  ;;  %v1320_v53 = vand.u32 31, %v1318_v51  ;;  %v2927_v11 = vadd.f32 %v639_v41, %v2813_v55  ;;  %v865_v39 = vsub.s32 4, %v2756_v9 }
  0xdd   : > { %2055 = vcosq.f32 %v867_v4  ;;  %v1313_v45 = vand.u32 8388607, %v1306_v21  ;;  %vm774_vm12 = vcmp.eq.s32.totalorder %v2796_v16, 2  ;;  %v1257_v18 = vmul.u32 %v1250_v60, %v1241_v49 }
  0xde   : > { %2057 = vsinq.f32 %v867_v4  ;;  %vm1259_vm13 = vc.u32 %v2909_v48, %v2917_v44  ;;  %v1321_v24 = vsub.s32 32, %v1320_v53  ;;  %vm771_vm14 = vcmp.eq.s32.totalorder %v2796_v16, 0 }
  0xdf   : > { %v2936_v35 = vmul.f32 2.0, %v985_v10  ;;  %v1260_v55 = vadd.s32 1, %v2918_v1  ;;  %v2939_v3 = vshrl.u32 %v1318_v51, 5  ;;  %v1323_v40 = vshll.u32 %v2186_v30, %v1320_v53 }
  0xe0   : > { %v1324_v7 = vshrl.u32 %v2187_v32, %v1321_v24  ;;  %v1326_v27 = vshll.u32 %v2187_v32, %v1320_v53  ;;  %v1327_v60 = vshrl.u32 %v2188_v34, %v1321_v24  ;;  %v1329_v58 = vshll.u32 %v2188_v34, %v1320_v53 }
  0xe1   : > { %v1261_v54 = vsel %vm1259_vm13, %v1260_v55, %v2918_v1  ;;  %v1330_v17 = vshrl.u32 %v2189_v36, %v1321_v24  ;;  %v1332_v19 = vshll.u32 %v2189_v36, %v1320_v53  ;;  %v1333_v52 = vshrl.u32 %v2190_v38, %v1321_v24 }
  0xe2   : > { %v649_v5 = vmul.f32 %v1863_v63, %v2843_v42  ;;  %vm770_vm15 = vcmp.lt.s32.totalorder %v2796_v16, 2  ;;  %v866_v32 = vsel %vm781_vm1, %v865_v39, %v2756_v9  ;;  %v1262_v41 = vadd.s32 %v1261_v54, %v1257_v18 }
  0xe3   : > { %v1335_v34 = vshll.u32 %v2190_v38, %v1320_v53  ;;  %v651_v31 = vmul.f32 %v1863_v63, %v1863_v63  ;;  %v1314_v14 = vor.u32 8388608, %v1313_v45  ;;  %v1334_v4 = vor.u32 %v1333_v52, %v1332_v19 }
  0xe4   : > { %v1336_v36 = vshrl.u32 %v2191_v46, %v1321_v24  ;;  %v1263_v22 = vadd.s32 536870912, %v1262_v41  ;;  %v1325_v51 = vor.u32 %v1324_v7, %v1323_v40  ;;  %v1328_v49 = vor.u32 %v1327_v60, %v1326_v27 }
  0xe5   : > { %vm1341_vm0 = vcmp.lt.s32.totalorder %v2939_v3, 4  ;;  %v868_v42 = vsel %vm2847_vm2, 0, %v866_v32  ;;  %v1105_v9 = vmul.f32 %v2936_v35, %v2936_v35  ;;  %v1331_v1 = vor.u32 %v1330_v17, %v1329_v58 }
  0xe6   : > { %vm1338_vm1 = vcmp.lt.s32.totalorder %v2939_v3, 1  ;;  %v645_v38 = vmul.f32 %v1863_v63, %v643_v20  ;;  %v2965_v10 = vshrl.u32 %v1263_v22, 30  ;;  %v1337_v53 = vor.u32 %v1336_v36, %v1335_v34 }
  0xe7   : > { %vm1340_vm3 = vcmp.lt.s32.totalorder %v2939_v3, 3  ;;  %v2968_v46 = vpop.eup %2055  ;;  %v1867_v39 = vadd.f32 -2.0, %v651_v31  ;;  %v657_v45 = vmul.f32 %v655_v50, %v649_v5  ;;  %v1347_v47 = vsel %vm1341_vm0, %v1334_v4, 920167782 }
  0xe8   : > { %v2974_v18 = vshll.u32 %v1314_v14, 8  ;;  %v2976_v55 = vpop.eup %2057  ;;  %v1079_v40 = vand.u32 3, %v868_v42  ;;  %v1265_v20 = vshll.u32 %v2965_v10, 30  ;;  %vm1339_vm2 = vcmp.lt.s32.totalorder %v2939_v3, 2 }
  0xe9   : > { %v1346_v63 = vsel %vm1338_vm1, %v1325_v51, %v1328_v49  ;;  %v776_v50 = vsel %vm774_vm12, %v775_v12, %v2839_v61  ;;  %v2987_v7 = vadd.f32 -2.0, %v1105_v9  ;;  %v1322_v27 = vshrl.u32 %v2186_v30, %v1321_v24 }
  0xea   : > { %v1348_v60 = vsel %vm1340_vm3, %v1331_v1, %v1347_v47  ;;  %v773_v58 = vsel %vm771_vm14, %v2833_v0, %v772_v26  ;;  %vm871_vm5 = vweird.f32 %v2442_v25  ;;  %v3000_v54 = vsub.s32 %v1262_v41, %v1265_v20 }
  0xeb   : > { %v1343_v12 = vsel %vm1341_vm0, %v1331_v1, 2102212464  ;;  %v1351_v30 = vsel %vm1341_vm0, %v1337_v53, 1326507024  ;;  %v876_v24 = vxor.u32 2147483648, %v2976_v55  ;;  %v879_v61 = vxor.u32 2147483648, %v2968_v46 }
  0xec   : > { %v1349_v0 = vsel %vm1339_vm2, %v1346_v63, %v1348_v60  ;;  %v1350_v26 = vsel %vm1338_vm1, %v1328_v49, %v1331_v1  ;;  %vm1081_vm6 = vcmp.eq.s32.totalorder %v1079_v40, 0  ;;  %vm1084_vm7 = vcmp.eq.s32.totalorder %v1079_v40, 2 }
  0xed   : > { %v1268_v17 = vsub.s32 0, %v3000_v54  ;;  %v1352_v19 = vsel %vm1340_vm3, %v1334_v4, %v1351_v30  ;;  %v777_v52 = vsel %vm770_vm15, %v773_v58, %v776_v50  ;;  %v1123_v5 = vmul.f32 %v2987_v7, %v2987_v7 }
  0xee   : > { %v1342_v32 = vsel %vm1338_vm1, %v1322_v27, %v1325_v51  ;;  %v1344_v41 = vsel %vm1340_vm3, %v1328_v49, %v1343_v12  ;;  %v1353_v31 = vsel %vm1339_vm2, %v1350_v26, %v1352_v19  ;;  %v872_v4 = vadd.s32 3, %v868_v42 }
  0xef   : > { %v1915_v34 = vmin.u32 %v1268_v17, %v3000_v54  ;;  %v3029_v14 = vmul.u32.u64.low %v2974_v18, %v1349_v0  ;;  %v3030_v16 = vmul.u32.u64.high %v2974_v18, %v1349_v0, %v3029_v14  ;;  %vm1080_vm8 = vcmp.lt.s32.totalorder %v1079_v40, 2 }
  0xf0   : > { %v1083_v36 = vsel %vm1081_vm6, %v2968_v46, %v876_v24  ;;  %v1086_v22 = vsel %vm1084_vm7, %v879_v61, %v2976_v55  ;;  %v778_v51 = vsel %vm767_vm4, nan, %v777_v52  ;;  %v647_v1 = vadd.f32 %v645_v38, %v2913_v23 }
  0xf1   : > { %v1270_v49 = vclz %v1915_v34  ;;  %v3044_v9 = vmul.u32.u64.low %v2974_v18, %v1353_v31  ;;  %v3045_v42 = vmul.u32.u64.high %v2974_v18, %v1353_v31, %v3044_v9  ;;  %v3049_v53 = vadd.f32 %v657_v45, %v2927_v11 }
  0xf2   : > { %v3051_v47 = vadd.f32 -2.0, %v1123_v5  ;;  %v1345_v40 = vsel %vm1339_vm2, %v1342_v32, %v1344_v41  ;;  %v663_v20 = vmul.f32 %v1867_v39, %v661_v6  ;;  %v1087_v63 = vsel %vm1080_vm8, %v1083_v36, %v1086_v22 }
  0xf3   : > { %v1152_v28 = vstv %s2998_s28  ;;  %v1916_v50 = vadd.s32 4294967294, %v1270_v49  ;;  %v873_v27 = vand.u32 3, %v872_v4  ;;  %v1093_v60 = vmul.f32 %v1092_v57, %v778_v51  ;;  %s1960_s28 = sshll.u32 %s2241_s0, 8  ;;  %s2192_s0 = smov [#allocation7]  }
  0xf4   : > { %v1164_v58 = vstv %s3008_s11  ;;  %v1258_v23 = vadd.s32 %v2917_v44, %v2909_v48  ;;  %v1361_v11 = vmul.u32 %v2974_v18, %v1345_v40  ;;  %vm1363_vm9 = vc.u32 %v3045_v42, %v3029_v14  ;;  %s1753_s11 = sshll.u32 %s139_s5, 4  ;;  %s3300_s11 = int_to_ptr.vmem [resolvable:$true] %s1753_s11 }
  0xf5   : > { %vm1917_vm4 = vcmp.lt.s32.totalorder %v1916_v50, 0  ;;  %v1364_v6 = vadd.s32 1, %v3030_v16  ;;  %v1088_v3 = vsel %vm871_vm5, nan, %v1087_v63  ;;  %v1103_v38 = vmul.f32 %v2936_v35, %v778_v51 }
  0xf6   : > { %v1141_v39 = vmul.f32 %v3051_v47, %v3051_v47  ;;  %v1273_v48 = vsel %vm1917_vm4, 0, %v1916_v50  ;;  %v3078_v30 = vadd.f32 %v663_v20, %v647_v1  ;;  %vm874_vm10 = vcmp.lt.s32.totalorder %v873_v27, 2 }
  0xf7   : > { %v1274_v44 = vsub.s32 32, %v1273_v48  ;;  %v1275_v45 = vshll.u32 %v3000_v54, %v1273_v48  ;;  %v1278_v18 = vsub.s32 4294967266, %v1273_v48  ;;  %v1365_v12 = vsel %vm1363_vm9, %v1364_v6, %v3030_v16 }
  0xf8   : > { %v1099_v0 = vmul.f32 %v1098_v8, %v2936_v35  ;;  %v1170_v26 = vstv %s3039_s12  ;;  %vm878_vm11 = vcmp.eq.s32.totalorder %v873_v27, 2  ;;  %v1366_v52 = vadd.s32 %v1365_v12, %v1361_v11 }
  0xf9   : > { %v1276_v17 = vshrl.u32 %v1258_v23, %v1274_v44  ;;  %v1279_v19 = vadd.s32 127, %v1278_v18  ;;  %vm875_vm12 = vcmp.eq.s32.totalorder %v873_v27, 0  ;;  %v3086_v54 = vmul.f32 2.0, %v1088_v3 }
  0xfa   : > { %v1095_v5 = vadd.f32 %v1093_v60, %v2883_v33  ;;  %v1899_v32 = vadd.f32 -2.0, %v1141_v39  ;;  %vm1204_vm13 = vcmp.lt.s32.totalorder %v2708_v56, 0  ;;  %v1111_v35 = vmul.f32 %v1110_v37, %v1103_v38 }
  0xfb   : > { %v1277_v41 = vor.u32 %v1276_v17, %v1275_v45  ;;  %v1280_v34 = vshll.u32 %v1279_v19, 23  ;;  %v1367_v31 = vadd.s32 536870912, %v1366_v52  ;;  %v880_v16 = vsel %vm878_vm11, %v879_v61, %v2976_v55 }
  0xfc   : > { %v1101_v33 = vadd.f32 %v1099_v0, %v2922_v59  ;;  %v1117_v4 = vmul.f32 %v2987_v7, %v1116_v29  ;;  %v1121_v36 = vmul.f32 %v2987_v7, %v1103_v38  ;;  %v877_v22 = vsel %vm875_vm12, %v2968_v46, %v876_v24 }
  0xfd   : > { %v1281_v51 = vor.u32 4788187, %v1280_v34  ;;  %v1284_v49 = vcvt.s32.f32 %v1277_v41  ;;  %v3108_v9 = vshrl.u32 %v1367_v31, 30  ;;  %v1106_v61 = vmul.f32 %v3086_v54, %v3086_v54 }
  0xfe   : > { %v1159_v1 = vmul.f32 %v1899_v32, %v1899_v32  ;;  %v1182_v59 = vstv %s3072_s15  ;;  %v1188_v40 = vstv %s3074_s16  ;;  %v1113_v20 = vadd.f32 %v1111_v35, %v1095_v5  ;;  %s3298_s16 = scalar_lea.hbm %s3344_s2, %s1960_s28 }
  0xff   : > { %vm3116_vm14 = vcmp.le.f32.partialorder %v1202_v13, 0.7853982  ;;  %v1282_v46 = vand.u32 2147483647, %v1281_v51  ;;  %v1369_v7 = vshll.u32 %v3108_v9, 30  ;;  %v881_v24 = vsel %vm874_vm10, %v877_v22, %v880_v16 }
 0x100   : > { %v1129_v63 = vmul.f32 %v1128_v2, %v1121_v36  ;;  %v1139_v50 = vmul.f32 %v3051_v47, %v1121_v36  ;;  %v1288_v60 = vsub.s32 4, %v2965_v10  ;;  %v1119_v23 = vadd.f32 %v1117_v4, %v1101_v33 }
 0x101   : > { %v1135_v13 = vmul.f32 %v3051_v47, %v1134_v43  ;;  %v1285_v11 = vmul.f32 %v1284_v49, %v1282_v46  ;;  %v3129_v6 = vsub.s32 %v1366_v52, %v1369_v7  ;;  %v1892_v27 = vadd.f32 -2.0, %v1106_v61 }
 0x102   : > { %v1903_v3 = vadd.f32 -2.0, %v1159_v1  ;;  %v1619_v38 = vstv %s3084_s17  ;;  %v1625_v39 = vstv %s3090_s18  ;;  %v882_v48 = vsel %vm871_vm5, nan, %v881_v24  ;;  %s1739_s17 = scalar_lea.sflag [#allocation6], %s2320_s7  ;;  %s2111_s18 = scalar_lea.vmem %s3300_s11, 256 }
 0x103   : > { %v1286_v44 = vxor.u32 2147483648, %v1285_v11  ;;  %v1372_v45 = vsub.s32 0, %v3129_v6  ;;  %v1637_v18 = vstv %s3094_s23  ;;  %v1131_v12 = vadd.f32 %v1129_v63, %v1113_v20  ;;  %p2112_p9 = scmp.ne.s32.totalorder %s3300_s11, %s2111_s18  ;;  %s2115_s23 = sshll.u32 %s2192_s0, 4  ;;  %s2116_s23 = int_to_ptr.vmem [resolvable:$false] %s2115_s23 }
 0x104   : > { %v1147_v47 = vmul.f32 %v1146_v15, %v1139_v50  ;;  %v1157_v0 = vmul.f32 %v1899_v32, %v1139_v50  ;;  %v1289_v17 = vsel %vm1204_vm13, %v1288_v60, %v2965_v10  ;;  %v1137_v19 = vadd.f32 %v1135_v13, %v1119_v23  ;;  %p2118_p7 = scmp.lt.s32.totalorder %s3300_s11, %s2116_s23 }
 0x105   : > { %v1153_v52 = vmul.f32 %v1899_v32, %v1152_v28  ;;  %v1287_v25 = vsel %vm1204_vm13, %v1286_v44, %v1285_v11  ;;  %v1919_v5 = vmin.u32 %v1372_v45, %v3129_v6  ;;  %v1094_v35 = vmul.f32 %v1092_v57, %v882_v48  ;;  %p2113_p1 = pnand %p2112_p9, %p3363_p0 }
 0x106   : > { %v1124_v41 = vmul.f32 %v1892_v27, %v1892_v27  ;;  %v1177_v34 = vmul.f32 %v1903_v3, %v1903_v3  ;;  %v1290_v31 = vsel %vm3116_vm14, %v2708_v56, %v1287_v25  ;;  %v1104_v10 = vmul.f32 %v3086_v54, %v882_v48 }
 0x107   : > { %v1291_v32 = vsel %vm3116_vm14, 0, %v1289_v17  ;;  %2059 = vcosq.f32 %v1290_v31  ;;  %v1374_v16 = vclz %v1919_v5  ;;  %v1149_v33 = vadd.f32 %v1147_v47, %v1131_v12  ;;  %p2114_p2 = pneg %p2113_p1 }
 0x108   : > { %v1165_v4 = vmul.f32 %v1164_v58, %v1157_v0  ;;  %2061 = vsinq.f32 %v1290_v31  ;;  %v1295_v57 = vadd.s32 3, %v1291_v32  ;;  %v1155_v36 = vadd.f32 %v1153_v52, %v1137_v19 }
 0x109   : > { %v1171_v22 = vmul.f32 %v1903_v3, %v1170_v26  ;;  %v1920_v51 = vadd.s32 4294967294, %v1374_v16  ;;  %v1643_v49 = vstv %s3131_s25  ;;  %v1096_v61 = vadd.f32 %v1094_v35, %v3049_v53  ;;  %s2117_s25 = scalar_lea.vmem %s2116_s23, 512 }
 0x10a   : > { %v1896_v1 = vadd.f32 -2.0, %v1124_v41  ;;  %v1175_v20 = vmul.f32 %v1903_v3, %v1157_v0  ;;  %v1907_v55 = vadd.f32 -2.0, %v1177_v34  ;;  %v1100_v46 = vmul.f32 %v1098_v8, %v3086_v54  ;;  %p2119_p13 = scmp.lt.s32.totalorder %s2117_s25, %s2111_s18 }
 0x10b   : > { %v1112_v7 = vmul.f32 %v1110_v37, %v1104_v10  ;;  %v1362_v24 = vadd.s32 %v3029_v14, %v3045_v42  ;;  %vm1921_vm15 = vcmp.lt.s32.totalorder %v1920_v51, 0  ;;  %v1122_v63 = vmul.f32 %v1892_v27, %v1104_v10 }
 0x10c   : > { %v1167_v50 = vadd.f32 %v1165_v4, %v1149_v33  ;;  %vm1294_vm0 = vweird.f32 %v2708_v56  ;;  %v1296_v53 = vand.u32 3, %v1295_v57  ;;  %v1377_v60 = vsel %vm1921_vm15, 0, %v1920_v51  ;;  %p2120_p4 = por %p2119_p13, %p2118_p7 }
 0x10d   : > { %v1378_v23 = vsub.s32 32, %v1377_v60  ;;  %v1379_v13 = vshll.u32 %v3129_v6, %v1377_v60  ;;  %v1382_v11 = vsub.s32 4294967266, %v1377_v60  ;;  %v1503_v8 = vand.u32 3, %v1291_v32 }
 0x10e   : > { %v1142_v54 = vmul.f32 %v1896_v1, %v1896_v1  ;;  %v1173_v3 = vadd.f32 %v1171_v22, %v1155_v36  ;;  %v1183_v37 = vmul.f32 %v1182_v59, %v1175_v20  ;;  %v1189_v14 = vmul.f32 %v1907_v55, %v1188_v40  ;;  %p2121_p6 = pnand %p2120_p4, %p2114_p2 }
 0x10f   : > { %v1102_v42 = vadd.f32 %v1100_v46, %v3078_v30  ;;  %v1114_v48 = vadd.f32 %v1112_v7, %v1096_v61  ;;  %v1380_v44 = vshrl.u32 %v1362_v24, %v1378_v23  ;;  %v1383_v45 = vadd.s32 127, %v1382_v11 }
 0x110   : > { %v1118_v12 = vmul.f32 %v1892_v27, %v1116_v29  ;;  %v1130_v47 = vmul.f32 %v1128_v2, %v1122_v63  ;;  %vm1297_vm1 = vcmp.lt.s32.totalorder %v1296_v53, 2  ;;  %vm1298_vm3 = vcmp.eq.s32.totalorder %v1296_v53, 0 }
 0x111   : > { %vm1308_vm2 = vcmp.lt.s32.totalorder %v2714_v62, 0  ;;  %v2060_v6 = vpop.eup %2059  ;;  %vm1301_vm5 = vcmp.eq.s32.totalorder %v1296_v53, 2  ;;  %vm3186_vm6 = vcmp.le.f32.partialorder %v1306_v21, 0.7853982  ;;  %v1381_v30 = vor.u32 %v1380_v44, %v1379_v13 }
 0x112   : > { %v1384_v17 = vshll.u32 %v1383_v45, 23  ;;  %vm1508_vm7 = vcmp.eq.s32.totalorder %v1503_v8, 2  ;;  %v2062_v29 = vpop.eup %2061  ;;  %v1140_v2 = vmul.f32 %v1896_v1, %v1122_v63  ;;  %v1900_v27 = vadd.f32 -2.0, %v1142_v54 }
 0x113   : > { %v1302_v19 = vxor.u32 2147483648, %v2060_v6  ;;  %vm1505_vm8 = vcmp.eq.s32.totalorder %v1503_v8, 0  ;;  %v1299_v52 = vxor.u32 2147483648, %v2062_v29  ;;  %v1388_v5 = vcvt.s32.f32 %v1381_v30 }
 0x114   : > { %v1385_v25 = vor.u32 4788187, %v1384_v17  ;;  %vm1504_vm4 = vcmp.lt.s32.totalorder %v1503_v8, 2  ;;  %v1120_v35 = vadd.f32 %v1118_v12, %v1102_v42  ;;  %v1132_v41 = vadd.f32 %v1130_v47, %v1114_v48 }
 0x115   : > { %v1303_v21 = vsel %vm1301_vm5, %v1302_v19, %v2062_v29  ;;  %v1510_v34 = vsel %vm1508_vm7, %v1302_v19, %v2062_v29  ;;  %v1136_v31 = vmul.f32 %v1896_v1, %v1134_v43  ;;  %v1300_v10 = vsel %vm1298_vm3, %v2060_v6, %v1299_v52 }
 0x116   : > { %v1386_v32 = vand.u32 2147483647, %v1385_v25  ;;  %v1507_v16 = vsel %vm1505_vm8, %v2060_v6, %v1299_v52  ;;  %v1160_v33 = vmul.f32 %v1900_v27, %v1900_v27  ;;  %v1304_v4 = vsel %vm1297_vm1, %v1300_v10, %v1303_v21 }
 0x117   : > { %v1392_v57 = vsub.s32 4, %v3108_v9  ;;  %v1511_v36 = vsel %vm1504_vm4, %v1507_v16, %v1510_v34  ;;  %v1148_v22 = vmul.f32 %v1146_v15, %v1140_v2  ;;  %v1305_v51 = vsel %vm1294_vm0, nan, %v1304_v4 }
 0x118   : > { %v1389_v61 = vmul.f32 %v1388_v5, %v1386_v32  ;;  %v1512_v43 = vsel %vm1294_vm0, nan, %v1511_v36  ;;  %v1158_v1 = vmul.f32 %v1900_v27, %v1140_v2  ;;  %v1185_v20 = vadd.f32 %v1183_v37, %v1167_v50 }
 0x119   : > { %v1616_v55 = vmul.f32 2.0, %v1512_v43  ;;  %v1655_v46 = vstv %s3182_s26  ;;  %v1138_v7 = vadd.f32 %v1136_v31, %v1120_v35  ;;  %v1191_v24 = vadd.f32 %v1189_v14, %v1173_v3 }
 0x11a   : > { %v1390_v63 = vxor.u32 2147483648, %v1389_v61  ;;  %v1620_v15 = vmul.f32 %v1619_v38, %v1305_v51  ;;  %v1904_v53 = vadd.f32 -2.0, %v1160_v33  ;;  %v1393_v56 = vsel %vm1308_vm2, %v1392_v57, %v3108_v9 }
 0x11b   : > { %v1630_v60 = vmul.f32 %v1616_v55, %v1305_v51  ;;  %v1632_v23 = vmul.f32 %v1616_v55, %v1616_v55  ;;  %v1150_v50 = vadd.f32 %v1148_v22, %v1132_v41  ;;  %v1154_v13 = vmul.f32 %v1900_v27, %v1152_v28 }
 0x11c   : > { %v1391_v11 = vsel %vm1308_vm2, %v1390_v63, %v1389_v61  ;;  %v1626_v8 = vmul.f32 %v1625_v39, %v1616_v55  ;;  %v1166_v54 = vmul.f32 %v1164_v58, %v1158_v1  ;;  %v1176_v3 = vmul.f32 %v1904_v53, %v1158_v1 }
 0x11d   : > { %v1394_v9 = vsel %vm3186_vm6, %v2714_v62, %v1391_v11  ;;  %v1932_v37 = vadd.f32 -2.0, %v1632_v23  ;;  %v1395_v28 = vsel %vm3186_vm6, 0, %v1393_v56  ;;  %v1622_v14 = vadd.f32 %v1620_v15, %v1185_v20 }
 0x11e   : > { %2063 = vcosq.f32 %v1394_v9  ;;  %v1638_v58 = vmul.f32 %v1637_v18, %v1630_v60  ;;  %v1178_v42 = vmul.f32 %v1904_v53, %v1904_v53  ;;  %v1399_v48 = vadd.s32 3, %v1395_v28 }
 0x11f   : > { %2065 = vsinq.f32 %v1394_v9  ;;  %v1648_v44 = vmul.f32 %v1932_v37, %v1630_v60  ;;  %v1628_v45 = vadd.f32 %v1626_v8, %v1191_v24  ;;  %v1644_v12 = vmul.f32 %v1932_v37, %v1643_v49 }
 0x120   : > { %v1650_v47 = vmul.f32 %v1932_v37, %v1932_v37  ;;  %v1156_v6 = vadd.f32 %v1154_v13, %v1138_v7  ;;  %v1168_v30 = vadd.f32 %v1166_v54, %v1150_v50  ;;  %v1172_v0 = vmul.f32 %v1904_v53, %v1170_v26 }
 0x121   : > { %v1661_v17 = vstv %s3203_s3  ;;  %v1184_v29 = vmul.f32 %v1182_v59, %v1176_v3  ;;  %v1640_v2 = vadd.f32 %v1638_v58, %v1622_v14  ;;  %v1656_v19 = vmul.f32 %v1655_v46, %v1648_v44 }
 0x122   : > { %v1936_v27 = vadd.f32 -2.0, %v1650_v47  ;;  %v1908_v52 = vadd.f32 -2.0, %v1178_v42  ;;  %vm1398_vm9 = vweird.f32 %v2714_v62  ;;  %v1400_v25 = vand.u32 3, %v1399_v48 }
 0x123   : > { %v1606_v5 = vand.u32 3, %v1395_v28  ;;  %v1673_v26 = vstv %s3210_s4  ;;  %v1646_v59 = vadd.f32 %v1644_v12, %v1628_v45  ;;  %v1174_v34 = vadd.f32 %v1172_v0, %v1156_v6 }
 0x124   : > { %v1662_v35 = vmul.f32 %v1936_v27, %v1661_v17  ;;  %v1666_v41 = vmul.f32 %v1936_v27, %v1648_v44  ;;  %v1668_v21 = vmul.f32 %v1936_v27, %v1936_v27  ;;  %v1679_v31 = vstv %s3218_s6 }
 0x125   : > { %v1691_v10 = vstv %s3225_s10  ;;  %v1697_v32 = vstv %s3227_s13  ;;  %v1186_v16 = vadd.f32 %v1184_v29, %v1168_v30  ;;  %v1658_v33 = vadd.f32 %v1656_v19, %v1640_v2 }
 0x126   : > { %v1940_v4 = vadd.f32 -2.0, %v1668_v21  ;;  %v1674_v57 = vmul.f32 %v1673_v26, %v1666_v41  ;;  %v1190_v36 = vmul.f32 %v1908_v52, %v1188_v40  ;;  %vm1405_vm10 = vcmp.eq.s32.totalorder %v1400_v25, 2 }
 0x127   : > { %vm1607_vm11 = vcmp.lt.s32.totalorder %v1606_v5, 2  ;;  %vm1611_vm12 = vcmp.eq.s32.totalorder %v1606_v5, 2  ;;  %v1664_v51 = vadd.f32 %v1662_v35, %v1646_v59  ;;  %vm1401_vm13 = vcmp.lt.s32.totalorder %v1400_v25, 2 }
 0x128   : > { %v2064_v22 = vpop.eup %2063  ;;  %v1680_v61 = vmul.f32 %v1940_v4, %v1679_v31  ;;  %v1684_v43 = vmul.f32 %v1940_v4, %v1666_v41  ;;  %v1686_v1 = vmul.f32 %v1940_v4, %v1940_v4  ;;  %vm1402_vm14 = vcmp.eq.s32.totalorder %v1400_v25, 0 }
 0x129   : > { %v2066_v20 = vpop.eup %2065  ;;  %v1406_v55 = vxor.u32 2147483648, %v2064_v22  ;;  %vm1608_vm15 = vcmp.eq.s32.totalorder %v1606_v5, 0  ;;  %v1676_v40 = vadd.f32 %v1674_v57, %v1658_v33  ;;  %v1709_v56 = vstv %s3242_s8 }
 0x12a   : > { %v1403_v7 = vxor.u32 2147483648, %v2066_v20  ;;  %v1944_v24 = vadd.f32 -2.0, %v1686_v1  ;;  %v1692_v63 = vmul.f32 %v1691_v10, %v1684_v43  ;;  %v1715_v60 = vstv %s3246_s9 }
 0x12b   : > { %v1407_v15 = vsel %vm1405_vm10, %v1406_v55, %v2066_v20  ;;  %v1613_v53 = vsel %vm1611_vm12, %v1406_v55, %v2066_v20  ;;  %v1682_v13 = vadd.f32 %v1680_v61, %v1664_v51  ;;  %v1192_v37 = vadd.f32 %v1190_v36, %v1174_v34 }
 0x12c   : > { %v1404_v23 = vsel %vm1402_vm14, %v2064_v22, %v1403_v7  ;;  %v1610_v50 = vsel %vm1608_vm15, %v2064_v22, %v1403_v7  ;;  %v1698_v11 = vmul.f32 %v1944_v24, %v1697_v32  ;;  %v1702_v3 = vmul.f32 %v1944_v24, %v1684_v43 }
 0x12d   : > { %v1408_v8 = vsel %vm1401_vm13, %v1404_v23, %v1407_v15  ;;  %v1614_v54 = vsel %vm1607_vm11, %v1610_v50, %v1613_v53  ;;  %v1704_v9 = vmul.f32 %v1944_v24, %v1944_v24  ;;  %v1694_v58 = vadd.f32 %v1692_v63, %v1676_v40 }
 0x12e   : > { %v1409_v28 = vsel %vm1398_vm9, nan, %v1408_v8  ;;  %v1615_v14 = vsel %vm1398_vm9, nan, %v1614_v54  ;;  %v1710_v45 = vmul.f32 %v1709_v56, %v1702_v3  ;;  %v1700_v12 = vadd.f32 %v1698_v11, %v1682_v13 }
 0x12f   : > { %v1617_v42 = vmul.f32 2.0, %v1615_v14  ;;  %v1621_v48 = vmul.f32 %v1619_v38, %v1409_v28  ;;  %v1948_v44 = vadd.f32 -2.0, %v1704_v9 }
 0x130   : > { %v1712_v29 = vadd.f32 %v1710_v45, %v1694_v58 }
 0x131   : > { %v1623_v47 = vadd.f32 %v1621_v48, %v1186_v16  ;;  %v1627_v6 = vmul.f32 %v1625_v39, %v1617_v42  ;;  %v1631_v30 = vmul.f32 %v1617_v42, %v1409_v28  ;;  %v1633_v0 = vmul.f32 %v1617_v42, %v1617_v42 }
 0x132   : > { %v1716_v2 = vmul.f32 %v1948_v44, %v1715_v60 }
 0x133   : > { %v1629_v62 = vadd.f32 %v1627_v6, %v1192_v37  ;;  %v1933_v27 = vadd.f32 -2.0, %v1633_v0  ;;  %v1639_v19 = vmul.f32 %v1637_v18, %v1631_v30 }
 0x134   : > { %v1718_v52 = vadd.f32 %v1716_v2, %v1700_v12 }
 0x135   : > { %v1641_v25 = vadd.f32 %v1639_v19, %v1623_v47  ;;  %v1645_v38 = vmul.f32 %v1933_v27, %v1643_v49  ;;  %v1649_v5 = vmul.f32 %v1933_v27, %v1631_v30  ;;  %v1651_v59 = vmul.f32 %v1933_v27, %v1933_v27 }
 0x136   : > { %v1720_v35 = vadd.f32 %v1718_v52, %v1712_v29 }
 0x137   : > { %v1647_v39 = vadd.f32 %v1645_v38, %v1629_v62  ;;  %v1937_v41 = vadd.f32 -2.0, %v1651_v59  ;;  %v1657_v21 = vmul.f32 %v1655_v46, %v1649_v5 }
 0x138   : > { %v1724_v34 = vmul.f32 2.0, %v1720_v35  ;;  %vm1722_vm0 = vcmp.lt.f32.partialorder %v1720_v35, 0.5 }
 0x139   : > { %v1659_v16 = vadd.f32 %v1657_v21, %v1641_v25  ;;  %v1663_v33 = vmul.f32 %v1937_v41, %v1661_v17  ;;  %v1667_v4 = vmul.f32 %v1937_v41, %v1649_v5  ;;  %v1669_v18 = vmul.f32 %v1937_v41, %v1937_v41 }
 0x13a   : > { %v1952_v57 = vadd.f32 -1.0, %v1724_v34 }
 0x13b   : > { %v1665_v36 = vadd.f32 %v1663_v33, %v1647_v39  ;;  %v1941_v22 = vadd.f32 -2.0, %v1669_v18  ;;  %v1675_v49 = vmul.f32 %v1673_v26, %v1667_v4 }
 0x13c   : > { %v1728_v51 = vmul.f32 1.442695, %v1952_v57 }
 0x13d   : > { %v1677_v61 = vadd.f32 %v1675_v49, %v1659_v16  ;;  %v1681_v43 = vmul.f32 %v1941_v22, %v1679_v31  ;;  %v1685_v1 = vmul.f32 %v1941_v22, %v1667_v4  ;;  %v1687_v46 = vmul.f32 %v1941_v22, %v1941_v22 }
 0x13e   : > { %2067 = vpow2.f32 %v1728_v51 }
 0x13f   : > { %v1683_v20 = vadd.f32 %v1681_v43, %v1665_v36  ;;  %v1945_v55 = vadd.f32 -2.0, %v1687_v46  ;;  %v1693_v17 = vmul.f32 %v1691_v10, %v1685_v1 }
 0x141   : > { %v1695_v7 = vadd.f32 %v1693_v17, %v1677_v61  ;;  %v1699_v40 = vmul.f32 %v1945_v55, %v1697_v32  ;;  %v1703_v24 = vmul.f32 %v1945_v55, %v1685_v1  ;;  %v1705_v63 = vmul.f32 %v1945_v55, %v1945_v55 }
 0x143   : > { %v1701_v15 = vadd.f32 %v1699_v40, %v1683_v20  ;;  %v1949_v53 = vadd.f32 -2.0, %v1705_v63  ;;  %v1711_v26 = vmul.f32 %v1709_v56, %v1703_v24 }
 0x145   : > { %v1713_v23 = vadd.f32 %v1711_v26, %v1695_v7  ;;  %v1717_v50 = vmul.f32 %v1949_v53, %v1715_v60 }
 0x147   : > { %v1719_v31 = vadd.f32 %v1717_v50, %v1701_v15 }
 0x148   : > { %v2068_v13 = vpop.eup %2067 }
 0x149   : > { %v1721_v11 = vadd.f32 %v1719_v31, %v1713_v23  ;;  %v1732_v8 = vmul.f32 0.5, %v2068_v13 }
 0x14b   : > { %v1725_v54 = vmul.f32 2.0, %v1721_v11  ;;  %v1734_v10 = vsel %vm1722_vm0, %v1732_v8, %v1720_v35  ;;  %vm1723_vm1 = vcmp.lt.f32.partialorder %v1721_v11, 0.5 }
 0x14c   : > { %1736 = vst [vmem:[%s139_s5] sm:$0xff] %v1734_v10 }
 0x14d   : > { %v1953_v32 = vadd.f32 -1.0, %v1725_v54 }
 0x14f   : > { %v1730_v3 = vmul.f32 1.442695, %v1953_v32 }
 0x151   : > { %2069 = vpow2.f32 %v1730_v3 }
 0x15b   : > { %v2070_v56 = vpop.eup %2069 }
 0x15c   : > { %v1733_v60 = vmul.f32 0.5, %v2070_v56 }
 0x15e   : > { %v1735_v9 = vsel %vm1723_vm1, %v1733_v60, %v1721_v11 }
 0x15f   : > { %1737 = vst [vmem:[%s139_s5 + $0x8] sm:$0xff] %v1735_v9 }
 0x160   : > { %2124 = shalt.err (!%p2121_p6)
}
 0x161   : > { %s2125_s7 = scalar_lea.hbm %s3298_s16, 256  ;;  %s2129_s4 = scalar_lea.hbm %s3344_s2, 512 }
 0x162   : > { %p2126_p8 = scmp.ne.s32.totalorder %s3298_s16, %s2125_s7  ;;  %p2130_p12 = scmp.lt.u32.totalorder %s3298_s16, %s3344_s2 }
 0x163   : > { %p2131_p3 = scmp.lt.u32.totalorder %s2129_s4, %s2125_s7  ;;  %p2133_p9 = scmp.lt.u32.totalorder %s2125_s7, %s3298_s16 }
 0x164   : > { %p2127_p10 = pnand %p2126_p8, %p3363_p0 }
 0x165   : > { %p2132_p5 = por %p2131_p3, %p2130_p12 }
 0x166   : > { %p2128_p11 = pneg %p2127_p10 }
 0x167   : > { %p2134_p1 = por %p2133_p9, %p2132_p5 }
 0x169   : > { %p2135_p2 = pnand %p2134_p1, %p2128_p11 }
 0x16b   : > { %2138 = shalt.err (!%p2135_p2)
}
 0x16c   : > { %1989 = dma.vmem_to_hbm [thread:$0]  (%p3363_p0), %s3300_s11, 256, %s3298_s16, %s1739_s17  }
 0x16d PF: > { %s1765_s13 = sand.u32 1, %s2167_s19   ;;  %p3364_p7 = scmp.ne.s32.totalorder %s3348_s30, 0 }
 0x16e   : > { %p3365_p13 = scmp.ge.s32.totalorder %s2179_s22, 2  ;;  %s1766_s8 = scalar_lea.sflag [#allocation6], %s1765_s13 }
 0x170   : > { %p1996_p4 = pnand %p3365_p13, %p3364_p7 }
 0x172   : > { %2162 = dma.done.wait (!%p1996_p4), %s1766_s8, 256  }
 0x173   : > { %2164 = vsyncadd (!%p1996_p4), %s1766_s8, 4294967040  ;;  %p19_p6 = scmp.ge.s32.totalorder %s2245_s24, 4   ;;  %s3366_s19 = smov %s2171_s20 }
 0x174   : > { %s3367_s20 = smov %s2175_s21  ;;  %s3368_s21 = smov %s2257_s27 }
 0x175   : > { %s3369_s22 = smov %s2245_s24  ;;  %21 = sbr.rel (!%p19_p6) target bundleno = 17 (0x11), region = 71 }
 0x17c   :  { %1771 = vsyncpa [#allocation5], 1 }
 0x17d   :  { %1773 = vsyncpa [#allocation5 + $0x1], 1 }
 0x17e   :  { %1774 = vsyncpa [#allocation6], 1 }
 0x17f   :  { %1776 = vsyncpa [#allocation6 + $0x1], 1 }

</bundles_post_ra>
